<compile_context>
chip_gen: v7x
topology: tpu7x:2x2x1
jax: 0.10.0
libtpu: 0.0.40
codegen_flags: <defaults>
</compile_context>

<pallas_src>
import functools
import math

import jax
import jax.numpy as jnp
from jax.experimental import pallas as pl
from jax.experimental.pallas import tpu as pltpu

LN_EPS = 1e-5
NEG_INF = -1e30


# ---------------------------------------------------------------------------
# Helpers
# ---------------------------------------------------------------------------

def _whole_array_spec(shape):
    """Block covering the whole array; constant index_map => DMA'd once, resident in VMEM."""
    zeros = (0,) * len(shape)
    return pl.BlockSpec(shape, lambda b, _z=zeros: _z)


def _layernorm(x, g, b):
    mu = jnp.mean(x, axis=-1, keepdims=True)
    var = jnp.mean(jnp.square(x - mu), axis=-1, keepdims=True)
    return (x - mu) * jax.lax.rsqrt(var + LN_EPS) * g + b


# ---------------------------------------------------------------------------
# Fused whole-forward Pallas kernel (one batch element per grid step)
# ---------------------------------------------------------------------------

def _fused_forward_kernel(x_ref, pe_ref, pin_w_ref, pin_b_ref, *rest,
                          num_blocks, n_heads, scale):
    S, E = x_ref.shape
    Dh = E // n_heads

    block_refs = rest[:12 * num_blocks]
    pout_w_ref, pout_b_ref, o_ref = rest[12 * num_blocks:]

    x = x_ref[...]                                                    # (S, E) f32

    # ---- proj_in + positional encoding ------------------------------------
    h = (jnp.dot(x.astype(jnp.bfloat16), pin_w_ref[...],
                 preferred_element_type=jnp.float32)
         + pin_b_ref[...] + pe_ref[...])                              # (S, E) f32

    # ---- causal additive bias, shared by all blocks, tiled across heads ----
    rows = jax.lax.broadcasted_iota(jnp.int32, (S, S), 0)
    cols = jax.lax.broadcasted_iota(jnp.int32, (S, S), 1)
    bias = jnp.where(cols <= rows, 0.0, NEG_INF).astype(jnp.float32)  # (S, S)
    bias_h = jnp.concatenate([bias] * n_heads, axis=0)                # (H*S, S)

    # ---- transformer encoder blocks (unrolled; everything stays in vregs) --
    for blk in range(num_blocks):
        (wqkv, bqkv, wo, bo, g1, b1, w1, c1, w2, c2, g2, b2) = \
            block_refs[12 * blk:12 * (blk + 1)]

        qkv = (jnp.dot(h.astype(jnp.bfloat16), wqkv[...],
                       preferred_element_type=jnp.float32) + bqkv[...])   # (S, 3E)
        qkv_b = qkv.astype(jnp.bfloat16)   # cast once, slice per head afterwards

        # scores for every head, stacked along sublanes -> one softmax pass
        scores = []
        for hh in range(n_heads):
            c0 = hh * Dh
            qh = qkv_b[:, c0:c0 + Dh]                       # (S, Dh)
            kh = qkv_b[:, E + c0:E + c0 + Dh]               # (S, Dh)
            scores.append(jax.lax.dot_general(               # q @ k^T, no transpose
                qh, kh, (((1,), (1,)), ((), ())),
                preferred_element_type=jnp.float32))
        s_all = jnp.concatenate(scores, axis=0) * scale + bias_h     # (H*S, S)

        m = jnp.max(s_all, axis=-1, keepdims=True)
        p = jnp.exp(s_all - m)
        p = p * pl.reciprocal(jnp.sum(p, axis=-1, keepdims=True), approx=True)
        p_b = p.astype(jnp.bfloat16)

        # per-head p @ V, concatenated in registers (no VMEM scratch)
        outs = []
        for hh in range(n_heads):
            c0 = hh * Dh
            vh = qkv_b[:, 2 * E + c0:2 * E + c0 + Dh]       # (S, Dh)
            ph = p_b[hh * S:(hh + 1) * S, :]                # (S, S)
            outs.append(jnp.dot(ph, vh, preferred_element_type=jnp.float32))
        attn = jnp.concatenate(outs, axis=-1)               # (S, E) f32

        # output projection + residual + LayerNorm (post-norm)
        a = (jnp.dot(attn.astype(jnp.bfloat16), wo[...],
                     preferred_element_type=jnp.float32) + bo[...])
        h1 = _layernorm(h + a, g1[...], b1[...])

        # feed-forward + residual + LayerNorm
        f = jnp.maximum(jnp.dot(h1.astype(jnp.bfloat16), w1[...],
                                preferred_element_type=jnp.float32) + c1[...], 0.0)
        f = (jnp.dot(f.astype(jnp.bfloat16), w2[...],
                     preferred_element_type=jnp.float32) + c2[...])
        h = _layernorm(h1 + f, g2[...], b2[...])

    # ---- proj_out ----------------------------------------------------------
    o_ref[...] = (jnp.dot(h.astype(jnp.bfloat16), pout_w_ref[...],
                          preferred_element_type=jnp.float32) + pout_b_ref[...])


# ---------------------------------------------------------------------------
# Parameter preparation (one-time: bf16 weight casts, (1,N) biases, PE)
# ---------------------------------------------------------------------------

def prepare_params(params, *, hidden_width, hidden_height):
    emb = params["proj_in_w"].shape[0]
    S = hidden_width * hidden_height

    pe2d = (jnp.tile(params["pe_col"], (hidden_width, 1, 1))
            + jnp.repeat(params["pe_row"], hidden_height, axis=0)).reshape(S, emb)

    def row(v):
        return v.reshape(1, -1).astype(jnp.float32)

    blocks_flat = []
    for blk in params["blocks"]:
        blocks_flat += [
            blk["in_proj_w"].astype(jnp.bfloat16), row(blk["in_proj_b"]),
            blk["out_proj_w"].astype(jnp.bfloat16), row(blk["out_proj_b"]),
            row(blk["ln1_g"]), row(blk["ln1_b"]),
            blk["ff1_w"].astype(jnp.bfloat16), row(blk["ff1_b"]),
            blk["ff2_w"].astype(jnp.bfloat16), row(blk["ff2_b"]),
            row(blk["ln2_g"]), row(blk["ln2_b"]),
        ]

    return {
        "pe2d": pe2d.astype(jnp.float32),
        "proj_in_w": params["proj_in_w"].astype(jnp.bfloat16),
        "proj_in_b": row(params["proj_in_b"]),
        "proj_out_w": params["proj_out_w"].astype(jnp.bfloat16),
        "proj_out_b": row(params["proj_out_b"]),
        "blocks_flat": tuple(blocks_flat),
    }


# ---------------------------------------------------------------------------
# Forward (single pallas_call; JAX glue is layout plumbing only)
# ---------------------------------------------------------------------------

def latent_generator_forward(prepared, x, *, n_heads):
    S, B, E = x.shape
    assert E % n_heads == 0
    Dh = E // n_heads
    num_blocks = len(prepared["blocks_flat"]) // 12

    # Batch-major flat layout (row = b*S + s) -> contiguous (S, E) slab per grid step.
    x2d = x.transpose(1, 0, 2).reshape(B * S, E)

    in_specs = [
        pl.BlockSpec((S, E), lambda b: (b, 0)),                 # activations (per batch)
        _whole_array_spec(prepared["pe2d"].shape),              # PE (shared)
        _whole_array_spec(prepared["proj_in_w"].shape),
        _whole_array_spec(prepared["proj_in_b"].shape),
    ]
    for arr in prepared["blocks_flat"]:
        in_specs.append(_whole_array_spec(arr.shape))
    in_specs += [
        _whole_array_spec(prepared["proj_out_w"].shape),
        _whole_array_spec(prepared["proj_out_b"].shape),
    ]

    out2d = pl.pallas_call(
        functools.partial(_fused_forward_kernel,
                          num_blocks=num_blocks, n_heads=n_heads,
                          scale=1.0 / math.sqrt(Dh)),
        out_shape=jax.ShapeDtypeStruct((B * S, E), jnp.float32),
        grid=(B,),
        in_specs=in_specs,
        out_specs=pl.BlockSpec((S, E), lambda b: (b, 0)),
        compiler_params=pltpu.CompilerParams(
            dimension_semantics=("parallel",)),                 # 1 batch elem per TC on v7x
    )(x2d, prepared["pe2d"], prepared["proj_in_w"], prepared["proj_in_b"],
      *prepared["blocks_flat"],
      prepared["proj_out_w"], prepared["proj_out_b"])

    return out2d.reshape(B, S, E).transpose(1, 0, 2)            # back to (S, B, E)


# ---------------------------------------------------------------------------
# Pure-JAX reference (f32) for the self-check
# ---------------------------------------------------------------------------

def reference_forward(params, x, *, hidden_width, hidden_height, n_heads):
    S, B, E = x.shape
    Dh = E // n_heads
    h = jnp.einsum("sbe,ef->sbf", x, params["proj_in_w"]) + params["proj_in_b"]
    pe = (jnp.tile(params["pe_col"], (hidden_width, 1, 1))
          + jnp.repeat(params["pe_row"], hidden_height, axis=0))
    h = h + pe
    causal = jnp.tril(jnp.ones((S, S), dtype=bool))
    for p in params["blocks"]:
        qkv = jnp.einsum("sbe,ef->sbf", h, p["in_proj_w"]) + p["in_proj_b"]
        q, k, v = jnp.split(qkv, 3, axis=-1)

        def to_heads(t):
            return t.reshape(S, B, n_heads, Dh).transpose(1, 2, 0, 3)  # (B,H,S,Dh)

        qh, kh, vh = to_heads(q), to_heads(k), to_heads(v)
        s = jnp.einsum("bhqd,bhkd->bhqk", qh, kh) / math.sqrt(Dh)
        s = jnp.where(causal, s, NEG_INF)
        a = jax.nn.softmax(s, axis=-1)
        o = jnp.einsum("bhqk,bhkd->bhqd", a, vh)
        o = o.transpose(2, 0, 1, 3).reshape(S, B, E)
        o = jnp.einsum("sbe,ef->sbf", o, p["out_proj_w"]) + p["out_proj_b"]
        h = _layernorm(h + o, p["ln1_g"], p["ln1_b"])
        f = jax.nn.relu(jnp.einsum("sbe,ef->sbf", h, p["ff1_w"]) + p["ff1_b"])
        f = jnp.einsum("sbf,fe->sbe", f, p["ff2_w"]) + p["ff2_b"]
        h = _layernorm(h + f, p["ln2_g"], p["ln2_b"])
    return jnp.einsum("sbe,ef->sbf", h, params["proj_out_w"]) + params["proj_out_b"]


# ---------------------------------------------------------------------------
# Deterministic parameter init
# ---------------------------------------------------------------------------

def init_params(key, emb, hidden_dim, num_blocks, hidden_width, hidden_height):
    def nrm(k, shape, scale=0.02):
        return (jax.random.normal(k, shape) * scale).astype(jnp.float32)

    keys = iter(jax.random.split(key, 8 + 4 * num_blocks))
    params = {
        "proj_in_w": nrm(next(keys), (emb, emb)),
        "proj_in_b": jnp.zeros((emb,), jnp.float32),
        "proj_out_w": nrm(next(keys), (emb, emb)),
        "proj_out_b": jnp.zeros((emb,), jnp.float32),
        "pe_col": jax.random.normal(next(keys), (hidden_width, 1, emb), jnp.float32),
        "pe_row": jax.random.normal(next(keys), (hidden_height, 1, emb), jnp.float32),
        "blocks": [],
    }
    for _ in range(num_blocks):
        params["blocks"].append({
            "in_proj_w": nrm(next(keys), (emb, 3 * emb)),
            "in_proj_b": jnp.zeros((3 * emb,), jnp.float32),
            "out_proj_w": nrm(next(keys), (emb, emb)),
            "out_proj_b": jnp.zeros((emb,), jnp.float32),
            "ln1_g": jnp.ones((emb,), jnp.float32),
            "ln1_b": jnp.zeros((emb,), jnp.float32),
            "ff1_w": nrm(next(keys), (emb, hidden_dim)),
            "ff1_b": jnp.zeros((hidden_dim,), jnp.float32),
            "ff2_w": nrm(next(keys), (hidden_dim, emb)),
            "ff2_b": jnp.zeros((emb,), jnp.float32),
            "ln2_g": jnp.ones((emb,), jnp.float32),
            "ln2_b": jnp.zeros((emb,), jnp.float32),
        })
    return params


# ---------------------------------------------------------------------------
# Main
# ---------------------------------------------------------------------------

if __name__ == "__main__":
    hidden_width = 4
    hidden_height = 4
    embedding_dim = 32
    num_blocks = 2
    hidden_dim = 64
    n_attn_heads = 4
    # dropout_prob = 0.1 -> identity in inference mode

    seq_len = hidden_width * hidden_height
    batch = 2

    key = jax.random.PRNGKey(0)
    k_params, k_x = jax.random.split(key)
    params = init_params(k_params, embedding_dim, hidden_dim, num_blocks,
                         hidden_width, hidden_height)
    x = jax.random.normal(k_x, (seq_len, batch, embedding_dim), jnp.float32)

    # One-time parameter prep (bf16 casts, bias/LN reshapes, PE) — outside the jitted forward.
    prepared = jax.tree_util.tree_map(
        lambda a: a, prepare_params(params, hidden_width=hidden_width,
                                    hidden_height=hidden_height))

    fwd = jax.jit(functools.partial(latent_generator_forward, n_heads=n_attn_heads))
    out = fwd(prepared, x)
    jax.block_until_ready(out)

    assert out.shape == (seq_len, batch, embedding_dim)
    assert bool(jnp.all(jnp.isfinite(out)))

    # Correctness check against a pure-JAX f32 reference (bf16 MXU operands => loose tol).
    ref = reference_forward(params, x, hidden_width=hidden_width,
                            hidden_height=hidden_height, n_heads=n_attn_heads)
    err = float(jnp.max(jnp.abs(out - ref)))
    assert err < 5e-2, f"max abs err vs reference: {err}"

    print("KERNEL_OK")
</pallas_src>

<mosaic_0001>
module attributes {stable_mosaic.version = 11 : i64} {
  func.func @_fused_forward_kernel(%arg0: i32, %arg1: memref<16x32xf32, #tpu.memory_space<vmem>>, %arg2: memref<16x32xf32, #tpu.memory_space<vmem>>, %arg3: memref<32x32xbf16, #tpu.memory_space<vmem>>, %arg4: memref<1x32xf32, #tpu.memory_space<vmem>>, %arg5: memref<32x96xbf16, #tpu.memory_space<vmem>>, %arg6: memref<1x96xf32, #tpu.memory_space<vmem>>, %arg7: memref<32x32xbf16, #tpu.memory_space<vmem>>, %arg8: memref<1x32xf32, #tpu.memory_space<vmem>>, %arg9: memref<1x32xf32, #tpu.memory_space<vmem>>, %arg10: memref<1x32xf32, #tpu.memory_space<vmem>>, %arg11: memref<32x64xbf16, #tpu.memory_space<vmem>>, %arg12: memref<1x64xf32, #tpu.memory_space<vmem>>, %arg13: memref<64x32xbf16, #tpu.memory_space<vmem>>, %arg14: memref<1x32xf32, #tpu.memory_space<vmem>>, %arg15: memref<1x32xf32, #tpu.memory_space<vmem>>, %arg16: memref<1x32xf32, #tpu.memory_space<vmem>>, %arg17: memref<32x96xbf16, #tpu.memory_space<vmem>>, %arg18: memref<1x96xf32, #tpu.memory_space<vmem>>, %arg19: memref<32x32xbf16, #tpu.memory_space<vmem>>, %arg20: memref<1x32xf32, #tpu.memory_space<vmem>>, %arg21: memref<1x32xf32, #tpu.memory_space<vmem>>, %arg22: memref<1x32xf32, #tpu.memory_space<vmem>>, %arg23: memref<32x64xbf16, #tpu.memory_space<vmem>>, %arg24: memref<1x64xf32, #tpu.memory_space<vmem>>, %arg25: memref<64x32xbf16, #tpu.memory_space<vmem>>, %arg26: memref<1x32xf32, #tpu.memory_space<vmem>>, %arg27: memref<1x32xf32, #tpu.memory_space<vmem>>, %arg28: memref<1x32xf32, #tpu.memory_space<vmem>>, %arg29: memref<32x32xbf16, #tpu.memory_space<vmem>>, %arg30: memref<1x32xf32, #tpu.memory_space<vmem>>, %arg31: memref<16x32xf32, #tpu.memory_space<vmem>>) attributes {dimension_semantics = [#tpu.dimension_semantics<parallel>], iteration_bounds = array<i64: 2>, scalar_prefetch = 0 : i64, scratch_operands = 0 : i64, tpu.core_type = #tpu.core_type<tc>, window_params = [{transform_indices = @transform_0, window_bounds = array<i64: 16, 32>}, {pipeline_mode = #tpu.pipeline_mode<synchronous>, transform_indices = @transform_1, window_bounds = array<i64: 16, 32>}, {pipeline_mode = #tpu.pipeline_mode<synchronous>, transform_indices = @transform_2, window_bounds = array<i64: 32, 32>}, {pipeline_mode = #tpu.pipeline_mode<synchronous>, transform_indices = @transform_3, window_bounds = array<i64: 1, 32>}, {pipeline_mode = #tpu.pipeline_mode<synchronous>, transform_indices = @transform_4, window_bounds = array<i64: 32, 96>}, {pipeline_mode = #tpu.pipeline_mode<synchronous>, transform_indices = @transform_5, window_bounds = array<i64: 1, 96>}, {pipeline_mode = #tpu.pipeline_mode<synchronous>, transform_indices = @transform_6, window_bounds = array<i64: 32, 32>}, {pipeline_mode = #tpu.pipeline_mode<synchronous>, transform_indices = @transform_7, window_bounds = array<i64: 1, 32>}, {pipeline_mode = #tpu.pipeline_mode<synchronous>, transform_indices = @transform_8, window_bounds = array<i64: 1, 32>}, {pipeline_mode = #tpu.pipeline_mode<synchronous>, transform_indices = @transform_9, window_bounds = array<i64: 1, 32>}, {pipeline_mode = #tpu.pipeline_mode<synchronous>, transform_indices = @transform_10, window_bounds = array<i64: 32, 64>}, {pipeline_mode = #tpu.pipeline_mode<synchronous>, transform_indices = @transform_11, window_bounds = array<i64: 1, 64>}, {pipeline_mode = #tpu.pipeline_mode<synchronous>, transform_indices = @transform_12, window_bounds = array<i64: 64, 32>}, {pipeline_mode = #tpu.pipeline_mode<synchronous>, transform_indices = @transform_13, window_bounds = array<i64: 1, 32>}, {pipeline_mode = #tpu.pipeline_mode<synchronous>, transform_indices = @transform_14, window_bounds = array<i64: 1, 32>}, {pipeline_mode = #tpu.pipeline_mode<synchronous>, transform_indices = @transform_15, window_bounds = array<i64: 1, 32>}, {pipeline_mode = #tpu.pipeline_mode<synchronous>, transform_indices = @transform_16, window_bounds = array<i64: 32, 96>}, {pipeline_mode = #tpu.pipeline_mode<synchronous>, transform_indices = @transform_17, window_bounds = array<i64: 1, 96>}, {pipeline_mode = #tpu.pipeline_mode<synchronous>, transform_indices = @transform_18, window_bounds = array<i64: 32, 32>}, {pipeline_mode = #tpu.pipeline_mode<synchronous>, transform_indices = @transform_19, window_bounds = array<i64: 1, 32>}, {pipeline_mode = #tpu.pipeline_mode<synchronous>, transform_indices = @transform_20, window_bounds = array<i64: 1, 32>}, {pipeline_mode = #tpu.pipeline_mode<synchronous>, transform_indices = @transform_21, window_bounds = array<i64: 1, 32>}, {pipeline_mode = #tpu.pipeline_mode<synchronous>, transform_indices = @transform_22, window_bounds = array<i64: 32, 64>}, {pipeline_mode = #tpu.pipeline_mode<synchronous>, transform_indices = @transform_23, window_bounds = array<i64: 1, 64>}, {pipeline_mode = #tpu.pipeline_mode<synchronous>, transform_indices = @transform_24, window_bounds = array<i64: 64, 32>}, {pipeline_mode = #tpu.pipeline_mode<synchronous>, transform_indices = @transform_25, window_bounds = array<i64: 1, 32>}, {pipeline_mode = #tpu.pipeline_mode<synchronous>, transform_indices = @transform_26, window_bounds = array<i64: 1, 32>}, {pipeline_mode = #tpu.pipeline_mode<synchronous>, transform_indices = @transform_27, window_bounds = array<i64: 1, 32>}, {pipeline_mode = #tpu.pipeline_mode<synchronous>, transform_indices = @transform_28, window_bounds = array<i64: 32, 32>}, {pipeline_mode = #tpu.pipeline_mode<synchronous>, transform_indices = @transform_29, window_bounds = array<i64: 1, 32>}, {transform_indices = @transform_30, window_bounds = array<i64: 16, 32>}]} {
    %c0 = arith.constant 0 : index
    %c0_0 = arith.constant 0 : index
    %0 = vector.load %arg1[%c0, %c0_0] : memref<16x32xf32, #tpu.memory_space<vmem>>, vector<16x32xf32>
    %1 = arith.truncf %0 : vector<16x32xf32> to vector<16x32xbf16>
    %c0_1 = arith.constant 0 : index
    %c0_2 = arith.constant 0 : index
    %2 = vector.load %arg3[%c0_1, %c0_2] : memref<32x32xbf16, #tpu.memory_space<vmem>>, vector<32x32xbf16>
    %cst = arith.constant dense<0.000000e+00> : vector<16x32xf32>
    %3 = tpu.matmul %1, %2, %cst {dimension_numbers = #tpu.dot_dimension_numbers<[1], [0], [0], [1], [0, 0, 1, 1], [], []>} : vector<16x32xbf16>, vector<32x32xbf16>, vector<16x32xf32> -> vector<16x32xf32>
    %c0_3 = arith.constant 0 : index
    %c0_4 = arith.constant 0 : index
    %4 = vector.load %arg4[%c0_3, %c0_4] : memref<1x32xf32, #tpu.memory_space<vmem>>, vector<1x32xf32>
    %5 = vector.broadcast %4 : vector<1x32xf32> to vector<16x32xf32>
    %6 = arith.addf %3, %5 : vector<16x32xf32>
    %c0_5 = arith.constant 0 : index
    %c0_6 = arith.constant 0 : index
    %7 = vector.load %arg2[%c0_5, %c0_6] : memref<16x32xf32, #tpu.memory_space<vmem>>, vector<16x32xf32>
    %8 = arith.addf %6, %7 : vector<16x32xf32>
    %9 = tpu.iota {dimensions = array<i32: 0>} : vector<16x16xi32>
    %10 = tpu.iota {dimensions = array<i32: 1>} : vector<16x16xi32>
    %11 = arith.cmpi sle, %10, %9 : vector<16x16xi32>
    %cst_7 = arith.constant 0.000000e+00 : f32
    %cst_8 = arith.constant -1.000000e+30 : f32
    %12 = vector.broadcast %cst_7 : f32 to vector<16x16xf32>
    %13 = vector.broadcast %cst_8 : f32 to vector<16x16xf32>
    %14 = arith.select %11, %12, %13 : vector<16x16xi1>, vector<16x16xf32>
    %15 = tpu.concatenate %14, %14, %14, %14 in 0 : vector<16x16xf32>, vector<16x16xf32>, vector<16x16xf32>, vector<16x16xf32> -> vector<64x16xf32>
    %16 = arith.truncf %8 : vector<16x32xf32> to vector<16x32xbf16>
    %c0_9 = arith.constant 0 : index
    %c0_10 = arith.constant 0 : index
    %17 = vector.load %arg5[%c0_9, %c0_10] : memref<32x96xbf16, #tpu.memory_space<vmem>>, vector<32x96xbf16>
    %cst_11 = arith.constant dense<0.000000e+00> : vector<16x96xf32>
    %18 = tpu.matmul %16, %17, %cst_11 {dimension_numbers = #tpu.dot_dimension_numbers<[1], [0], [0], [1], [0, 0, 1, 1], [], []>} : vector<16x32xbf16>, vector<32x96xbf16>, vector<16x96xf32> -> vector<16x96xf32>
    %c0_12 = arith.constant 0 : index
    %c0_13 = arith.constant 0 : index
    %19 = vector.load %arg6[%c0_12, %c0_13] : memref<1x96xf32, #tpu.memory_space<vmem>>, vector<1x96xf32>
    %20 = vector.broadcast %19 : vector<1x96xf32> to vector<16x96xf32>
    %21 = arith.addf %18, %20 : vector<16x96xf32>
    %22 = arith.truncf %21 : vector<16x96xf32> to vector<16x96xbf16>
    %23 = vector.extract_strided_slice %22 {offsets = [0, 0], sizes = [16, 8], strides = [1, 1]} : vector<16x96xbf16> to vector<16x8xbf16>
    %24 = vector.extract_strided_slice %22 {offsets = [0, 32], sizes = [16, 8], strides = [1, 1]} : vector<16x96xbf16> to vector<16x8xbf16>
    %cst_14 = arith.constant dense<0.000000e+00> : vector<16x16xf32>
    %25 = tpu.matmul %23, %24, %cst_14 {dimension_numbers = #tpu.dot_dimension_numbers<[1], [1], [0], [0], [0, 0, 1, 0], [], []>} : vector<16x8xbf16>, vector<16x8xbf16>, vector<16x16xf32> -> vector<16x16xf32>
    %26 = vector.extract_strided_slice %22 {offsets = [0, 8], sizes = [16, 8], strides = [1, 1]} : vector<16x96xbf16> to vector<16x8xbf16>
    %27 = vector.extract_strided_slice %22 {offsets = [0, 40], sizes = [16, 8], strides = [1, 1]} : vector<16x96xbf16> to vector<16x8xbf16>
    %cst_15 = arith.constant dense<0.000000e+00> : vector<16x16xf32>
    %28 = tpu.matmul %26, %27, %cst_15 {dimension_numbers = #tpu.dot_dimension_numbers<[1], [1], [0], [0], [0, 0, 1, 0], [], []>} : vector<16x8xbf16>, vector<16x8xbf16>, vector<16x16xf32> -> vector<16x16xf32>
    %29 = vector.extract_strided_slice %22 {offsets = [0, 16], sizes = [16, 8], strides = [1, 1]} : vector<16x96xbf16> to vector<16x8xbf16>
    %30 = vector.extract_strided_slice %22 {offsets = [0, 48], sizes = [16, 8], strides = [1, 1]} : vector<16x96xbf16> to vector<16x8xbf16>
    %cst_16 = arith.constant dense<0.000000e+00> : vector<16x16xf32>
    %31 = tpu.matmul %29, %30, %cst_16 {dimension_numbers = #tpu.dot_dimension_numbers<[1], [1], [0], [0], [0, 0, 1, 0], [], []>} : vector<16x8xbf16>, vector<16x8xbf16>, vector<16x16xf32> -> vector<16x16xf32>
    %32 = vector.extract_strided_slice %22 {offsets = [0, 24], sizes = [16, 8], strides = [1, 1]} : vector<16x96xbf16> to vector<16x8xbf16>
    %33 = vector.extract_strided_slice %22 {offsets = [0, 56], sizes = [16, 8], strides = [1, 1]} : vector<16x96xbf16> to vector<16x8xbf16>
    %cst_17 = arith.constant dense<0.000000e+00> : vector<16x16xf32>
    %34 = tpu.matmul %32, %33, %cst_17 {dimension_numbers = #tpu.dot_dimension_numbers<[1], [1], [0], [0], [0, 0, 1, 0], [], []>} : vector<16x8xbf16>, vector<16x8xbf16>, vector<16x16xf32> -> vector<16x16xf32>
    %35 = tpu.concatenate %25, %28, %31, %34 in 0 : vector<16x16xf32>, vector<16x16xf32>, vector<16x16xf32>, vector<16x16xf32> -> vector<64x16xf32>
    %cst_18 = arith.constant 0.353553385 : f32
    %36 = vector.broadcast %cst_18 : f32 to vector<64x16xf32>
    %37 = arith.mulf %35, %36 : vector<64x16xf32>
    %38 = arith.addf %37, %15 : vector<64x16xf32>
    %cst_19 = arith.constant dense<0xFF800000> : vector<64xf32>
    %39 = vector.multi_reduction <maximumf>, %38, %cst_19 [1] : vector<64x16xf32> to vector<64xf32>
    %40 = vector.shape_cast %39 : vector<64xf32> to vector<64x1xf32>
    %41 = vector.broadcast %40 : vector<64x1xf32> to vector<64x16xf32>
    %42 = arith.subf %38, %41 : vector<64x16xf32>
    %43 = math.exp %42 : vector<64x16xf32>
    %cst_20 = arith.constant dense<0.000000e+00> : vector<64xf32>
    %44 = vector.multi_reduction <add>, %43, %cst_20 [1] : vector<64x16xf32> to vector<64xf32>
    %45 = vector.shape_cast %44 : vector<64xf32> to vector<64x1xf32>
    %46 = tpu.reciprocal %45 {approx = true} : vector<64x1xf32> -> vector<64x1xf32>
    %47 = vector.broadcast %46 : vector<64x1xf32> to vector<64x16xf32>
    %48 = arith.mulf %43, %47 : vector<64x16xf32>
    %49 = arith.truncf %48 : vector<64x16xf32> to vector<64x16xbf16>
    %50 = vector.extract_strided_slice %22 {offsets = [0, 64], sizes = [16, 8], strides = [1, 1]} : vector<16x96xbf16> to vector<16x8xbf16>
    %51 = vector.extract_strided_slice %49 {offsets = [0, 0], sizes = [16, 16], strides = [1, 1]} : vector<64x16xbf16> to vector<16x16xbf16>
    %cst_21 = arith.constant dense<0.000000e+00> : vector<16x8xf32>
    %52 = tpu.matmul %51, %50, %cst_21 {dimension_numbers = #tpu.dot_dimension_numbers<[1], [0], [0], [1], [0, 0, 1, 1], [], []>} : vector<16x16xbf16>, vector<16x8xbf16>, vector<16x8xf32> -> vector<16x8xf32>
    %53 = vector.extract_strided_slice %22 {offsets = [0, 72], sizes = [16, 8], strides = [1, 1]} : vector<16x96xbf16> to vector<16x8xbf16>
    %54 = vector.extract_strided_slice %49 {offsets = [16, 0], sizes = [16, 16], strides = [1, 1]} : vector<64x16xbf16> to vector<16x16xbf16>
    %cst_22 = arith.constant dense<0.000000e+00> : vector<16x8xf32>
    %55 = tpu.matmul %54, %53, %cst_22 {dimension_numbers = #tpu.dot_dimension_numbers<[1], [0], [0], [1], [0, 0, 1, 1], [], []>} : vector<16x16xbf16>, vector<16x8xbf16>, vector<16x8xf32> -> vector<16x8xf32>
    %56 = vector.extract_strided_slice %22 {offsets = [0, 80], sizes = [16, 8], strides = [1, 1]} : vector<16x96xbf16> to vector<16x8xbf16>
    %57 = vector.extract_strided_slice %49 {offsets = [32, 0], sizes = [16, 16], strides = [1, 1]} : vector<64x16xbf16> to vector<16x16xbf16>
    %cst_23 = arith.constant dense<0.000000e+00> : vector<16x8xf32>
    %58 = tpu.matmul %57, %56, %cst_23 {dimension_numbers = #tpu.dot_dimension_numbers<[1], [0], [0], [1], [0, 0, 1, 1], [], []>} : vector<16x16xbf16>, vector<16x8xbf16>, vector<16x8xf32> -> vector<16x8xf32>
    %59 = vector.extract_strided_slice %22 {offsets = [0, 88], sizes = [16, 8], strides = [1, 1]} : vector<16x96xbf16> to vector<16x8xbf16>
    %60 = vector.extract_strided_slice %49 {offsets = [48, 0], sizes = [16, 16], strides = [1, 1]} : vector<64x16xbf16> to vector<16x16xbf16>
    %cst_24 = arith.constant dense<0.000000e+00> : vector<16x8xf32>
    %61 = tpu.matmul %60, %59, %cst_24 {dimension_numbers = #tpu.dot_dimension_numbers<[1], [0], [0], [1], [0, 0, 1, 1], [], []>} : vector<16x16xbf16>, vector<16x8xbf16>, vector<16x8xf32> -> vector<16x8xf32>
    %62 = tpu.concatenate %52, %55, %58, %61 in 1 : vector<16x8xf32>, vector<16x8xf32>, vector<16x8xf32>, vector<16x8xf32> -> vector<16x32xf32>
    %63 = arith.truncf %62 : vector<16x32xf32> to vector<16x32xbf16>
    %c0_25 = arith.constant 0 : index
    %c0_26 = arith.constant 0 : index
    %64 = vector.load %arg7[%c0_25, %c0_26] : memref<32x32xbf16, #tpu.memory_space<vmem>>, vector<32x32xbf16>
    %cst_27 = arith.constant dense<0.000000e+00> : vector<16x32xf32>
    %65 = tpu.matmul %63, %64, %cst_27 {dimension_numbers = #tpu.dot_dimension_numbers<[1], [0], [0], [1], [0, 0, 1, 1], [], []>} : vector<16x32xbf16>, vector<32x32xbf16>, vector<16x32xf32> -> vector<16x32xf32>
    %c0_28 = arith.constant 0 : index
    %c0_29 = arith.constant 0 : index
    %66 = vector.load %arg8[%c0_28, %c0_29] : memref<1x32xf32, #tpu.memory_space<vmem>>, vector<1x32xf32>
    %67 = vector.broadcast %66 : vector<1x32xf32> to vector<16x32xf32>
    %68 = arith.addf %65, %67 : vector<16x32xf32>
    %69 = arith.addf %8, %68 : vector<16x32xf32>
    %c0_30 = arith.constant 0 : index
    %c0_31 = arith.constant 0 : index
    %70 = vector.load %arg9[%c0_30, %c0_31] : memref<1x32xf32, #tpu.memory_space<vmem>>, vector<1x32xf32>
    %c0_32 = arith.constant 0 : index
    %c0_33 = arith.constant 0 : index
    %71 = vector.load %arg10[%c0_32, %c0_33] : memref<1x32xf32, #tpu.memory_space<vmem>>, vector<1x32xf32>
    %cst_34 = arith.constant dense<0.000000e+00> : vector<16xf32>
    %72 = vector.multi_reduction <add>, %69, %cst_34 [1] : vector<16x32xf32> to vector<16xf32>
    %73 = vector.shape_cast %72 : vector<16xf32> to vector<16x1xf32>
    %cst_35 = arith.constant 3.200000e+01 : f32
    %74 = vector.broadcast %cst_35 : f32 to vector<16x1xf32>
    %75 = arith.divf %73, %74 : vector<16x1xf32>
    %76 = vector.broadcast %75 : vector<16x1xf32> to vector<16x32xf32>
    %77 = arith.subf %69, %76 : vector<16x32xf32>
    %78 = arith.mulf %77, %77 : vector<16x32xf32>
    %cst_36 = arith.constant dense<0.000000e+00> : vector<16xf32>
    %79 = vector.multi_reduction <add>, %78, %cst_36 [1] : vector<16x32xf32> to vector<16xf32>
    %80 = vector.shape_cast %79 : vector<16xf32> to vector<16x1xf32>
    %cst_37 = arith.constant 3.200000e+01 : f32
    %81 = vector.broadcast %cst_37 : f32 to vector<16x1xf32>
    %82 = arith.divf %80, %81 : vector<16x1xf32>
    %83 = vector.broadcast %75 : vector<16x1xf32> to vector<16x32xf32>
    %84 = arith.subf %69, %83 : vector<16x32xf32>
    %cst_38 = arith.constant 9.99999974E-6 : f32
    %85 = vector.broadcast %cst_38 : f32 to vector<16x1xf32>
    %86 = arith.addf %82, %85 : vector<16x1xf32>
    %87 = math.rsqrt %86 : vector<16x1xf32>
    %88 = vector.broadcast %87 : vector<16x1xf32> to vector<16x32xf32>
    %89 = arith.mulf %84, %88 : vector<16x32xf32>
    %90 = vector.broadcast %70 : vector<1x32xf32> to vector<16x32xf32>
    %91 = arith.mulf %89, %90 : vector<16x32xf32>
    %92 = vector.broadcast %71 : vector<1x32xf32> to vector<16x32xf32>
    %93 = arith.addf %91, %92 : vector<16x32xf32>
    %94 = arith.truncf %93 : vector<16x32xf32> to vector<16x32xbf16>
    %c0_39 = arith.constant 0 : index
    %c0_40 = arith.constant 0 : index
    %95 = vector.load %arg11[%c0_39, %c0_40] : memref<32x64xbf16, #tpu.memory_space<vmem>>, vector<32x64xbf16>
    %cst_41 = arith.constant dense<0.000000e+00> : vector<16x64xf32>
    %96 = tpu.matmul %94, %95, %cst_41 {dimension_numbers = #tpu.dot_dimension_numbers<[1], [0], [0], [1], [0, 0, 1, 1], [], []>} : vector<16x32xbf16>, vector<32x64xbf16>, vector<16x64xf32> -> vector<16x64xf32>
    %c0_42 = arith.constant 0 : index
    %c0_43 = arith.constant 0 : index
    %97 = vector.load %arg12[%c0_42, %c0_43] : memref<1x64xf32, #tpu.memory_space<vmem>>, vector<1x64xf32>
    %98 = vector.broadcast %97 : vector<1x64xf32> to vector<16x64xf32>
    %99 = arith.addf %96, %98 : vector<16x64xf32>
    %cst_44 = arith.constant 0.000000e+00 : f32
    %100 = vector.broadcast %cst_44 : f32 to vector<16x64xf32>
    %101 = arith.maximumf %99, %100 : vector<16x64xf32>
    %102 = arith.truncf %101 : vector<16x64xf32> to vector<16x64xbf16>
    %c0_45 = arith.constant 0 : index
    %c0_46 = arith.constant 0 : index
    %103 = vector.load %arg13[%c0_45, %c0_46] : memref<64x32xbf16, #tpu.memory_space<vmem>>, vector<64x32xbf16>
    %cst_47 = arith.constant dense<0.000000e+00> : vector<16x32xf32>
    %104 = tpu.matmul %102, %103, %cst_47 {dimension_numbers = #tpu.dot_dimension_numbers<[1], [0], [0], [1], [0, 0, 1, 1], [], []>} : vector<16x64xbf16>, vector<64x32xbf16>, vector<16x32xf32> -> vector<16x32xf32>
    %c0_48 = arith.constant 0 : index
    %c0_49 = arith.constant 0 : index
    %105 = vector.load %arg14[%c0_48, %c0_49] : memref<1x32xf32, #tpu.memory_space<vmem>>, vector<1x32xf32>
    %106 = vector.broadcast %105 : vector<1x32xf32> to vector<16x32xf32>
    %107 = arith.addf %104, %106 : vector<16x32xf32>
    %108 = arith.addf %93, %107 : vector<16x32xf32>
    %c0_50 = arith.constant 0 : index
    %c0_51 = arith.constant 0 : index
    %109 = vector.load %arg15[%c0_50, %c0_51] : memref<1x32xf32, #tpu.memory_space<vmem>>, vector<1x32xf32>
    %c0_52 = arith.constant 0 : index
    %c0_53 = arith.constant 0 : index
    %110 = vector.load %arg16[%c0_52, %c0_53] : memref<1x32xf32, #tpu.memory_space<vmem>>, vector<1x32xf32>
    %cst_54 = arith.constant dense<0.000000e+00> : vector<16xf32>
    %111 = vector.multi_reduction <add>, %108, %cst_54 [1] : vector<16x32xf32> to vector<16xf32>
    %112 = vector.shape_cast %111 : vector<16xf32> to vector<16x1xf32>
    %cst_55 = arith.constant 3.200000e+01 : f32
    %113 = vector.broadcast %cst_55 : f32 to vector<16x1xf32>
    %114 = arith.divf %112, %113 : vector<16x1xf32>
    %115 = vector.broadcast %114 : vector<16x1xf32> to vector<16x32xf32>
    %116 = arith.subf %108, %115 : vector<16x32xf32>
    %117 = arith.mulf %116, %116 : vector<16x32xf32>
    %cst_56 = arith.constant dense<0.000000e+00> : vector<16xf32>
    %118 = vector.multi_reduction <add>, %117, %cst_56 [1] : vector<16x32xf32> to vector<16xf32>
    %119 = vector.shape_cast %118 : vector<16xf32> to vector<16x1xf32>
    %cst_57 = arith.constant 3.200000e+01 : f32
    %120 = vector.broadcast %cst_57 : f32 to vector<16x1xf32>
    %121 = arith.divf %119, %120 : vector<16x1xf32>
    %122 = vector.broadcast %114 : vector<16x1xf32> to vector<16x32xf32>
    %123 = arith.subf %108, %122 : vector<16x32xf32>
    %cst_58 = arith.constant 9.99999974E-6 : f32
    %124 = vector.broadcast %cst_58 : f32 to vector<16x1xf32>
    %125 = arith.addf %121, %124 : vector<16x1xf32>
    %126 = math.rsqrt %125 : vector<16x1xf32>
    %127 = vector.broadcast %126 : vector<16x1xf32> to vector<16x32xf32>
    %128 = arith.mulf %123, %127 : vector<16x32xf32>
    %129 = vector.broadcast %109 : vector<1x32xf32> to vector<16x32xf32>
    %130 = arith.mulf %128, %129 : vector<16x32xf32>
    %131 = vector.broadcast %110 : vector<1x32xf32> to vector<16x32xf32>
    %132 = arith.addf %130, %131 : vector<16x32xf32>
    %133 = arith.truncf %132 : vector<16x32xf32> to vector<16x32xbf16>
    %c0_59 = arith.constant 0 : index
    %c0_60 = arith.constant 0 : index
    %134 = vector.load %arg17[%c0_59, %c0_60] : memref<32x96xbf16, #tpu.memory_space<vmem>>, vector<32x96xbf16>
    %cst_61 = arith.constant dense<0.000000e+00> : vector<16x96xf32>
    %135 = tpu.matmul %133, %134, %cst_61 {dimension_numbers = #tpu.dot_dimension_numbers<[1], [0], [0], [1], [0, 0, 1, 1], [], []>} : vector<16x32xbf16>, vector<32x96xbf16>, vector<16x96xf32> -> vector<16x96xf32>
    %c0_62 = arith.constant 0 : index
    %c0_63 = arith.constant 0 : index
    %136 = vector.load %arg18[%c0_62, %c0_63] : memref<1x96xf32, #tpu.memory_space<vmem>>, vector<1x96xf32>
    %137 = vector.broadcast %136 : vector<1x96xf32> to vector<16x96xf32>
    %138 = arith.addf %135, %137 : vector<16x96xf32>
    %139 = arith.truncf %138 : vector<16x96xf32> to vector<16x96xbf16>
    %140 = vector.extract_strided_slice %139 {offsets = [0, 0], sizes = [16, 8], strides = [1, 1]} : vector<16x96xbf16> to vector<16x8xbf16>
    %141 = vector.extract_strided_slice %139 {offsets = [0, 32], sizes = [16, 8], strides = [1, 1]} : vector<16x96xbf16> to vector<16x8xbf16>
    %cst_64 = arith.constant dense<0.000000e+00> : vector<16x16xf32>
    %142 = tpu.matmul %140, %141, %cst_64 {dimension_numbers = #tpu.dot_dimension_numbers<[1], [1], [0], [0], [0, 0, 1, 0], [], []>} : vector<16x8xbf16>, vector<16x8xbf16>, vector<16x16xf32> -> vector<16x16xf32>
    %143 = vector.extract_strided_slice %139 {offsets = [0, 8], sizes = [16, 8], strides = [1, 1]} : vector<16x96xbf16> to vector<16x8xbf16>
    %144 = vector.extract_strided_slice %139 {offsets = [0, 40], sizes = [16, 8], strides = [1, 1]} : vector<16x96xbf16> to vector<16x8xbf16>
    %cst_65 = arith.constant dense<0.000000e+00> : vector<16x16xf32>
    %145 = tpu.matmul %143, %144, %cst_65 {dimension_numbers = #tpu.dot_dimension_numbers<[1], [1], [0], [0], [0, 0, 1, 0], [], []>} : vector<16x8xbf16>, vector<16x8xbf16>, vector<16x16xf32> -> vector<16x16xf32>
    %146 = vector.extract_strided_slice %139 {offsets = [0, 16], sizes = [16, 8], strides = [1, 1]} : vector<16x96xbf16> to vector<16x8xbf16>
    %147 = vector.extract_strided_slice %139 {offsets = [0, 48], sizes = [16, 8], strides = [1, 1]} : vector<16x96xbf16> to vector<16x8xbf16>
    %cst_66 = arith.constant dense<0.000000e+00> : vector<16x16xf32>
    %148 = tpu.matmul %146, %147, %cst_66 {dimension_numbers = #tpu.dot_dimension_numbers<[1], [1], [0], [0], [0, 0, 1, 0], [], []>} : vector<16x8xbf16>, vector<16x8xbf16>, vector<16x16xf32> -> vector<16x16xf32>
    %149 = vector.extract_strided_slice %139 {offsets = [0, 24], sizes = [16, 8], strides = [1, 1]} : vector<16x96xbf16> to vector<16x8xbf16>
    %150 = vector.extract_strided_slice %139 {offsets = [0, 56], sizes = [16, 8], strides = [1, 1]} : vector<16x96xbf16> to vector<16x8xbf16>
    %cst_67 = arith.constant dense<0.000000e+00> : vector<16x16xf32>
    %151 = tpu.matmul %149, %150, %cst_67 {dimension_numbers = #tpu.dot_dimension_numbers<[1], [1], [0], [0], [0, 0, 1, 0], [], []>} : vector<16x8xbf16>, vector<16x8xbf16>, vector<16x16xf32> -> vector<16x16xf32>
    %152 = tpu.concatenate %142, %145, %148, %151 in 0 : vector<16x16xf32>, vector<16x16xf32>, vector<16x16xf32>, vector<16x16xf32> -> vector<64x16xf32>
    %cst_68 = arith.constant 0.353553385 : f32
    %153 = vector.broadcast %cst_68 : f32 to vector<64x16xf32>
    %154 = arith.mulf %152, %153 : vector<64x16xf32>
    %155 = arith.addf %154, %15 : vector<64x16xf32>
    %cst_69 = arith.constant dense<0xFF800000> : vector<64xf32>
    %156 = vector.multi_reduction <maximumf>, %155, %cst_69 [1] : vector<64x16xf32> to vector<64xf32>
    %157 = vector.shape_cast %156 : vector<64xf32> to vector<64x1xf32>
    %158 = vector.broadcast %157 : vector<64x1xf32> to vector<64x16xf32>
    %159 = arith.subf %155, %158 : vector<64x16xf32>
    %160 = math.exp %159 : vector<64x16xf32>
    %cst_70 = arith.constant dense<0.000000e+00> : vector<64xf32>
    %161 = vector.multi_reduction <add>, %160, %cst_70 [1] : vector<64x16xf32> to vector<64xf32>
    %162 = vector.shape_cast %161 : vector<64xf32> to vector<64x1xf32>
    %163 = tpu.reciprocal %162 {approx = true} : vector<64x1xf32> -> vector<64x1xf32>
    %164 = vector.broadcast %163 : vector<64x1xf32> to vector<64x16xf32>
    %165 = arith.mulf %160, %164 : vector<64x16xf32>
    %166 = arith.truncf %165 : vector<64x16xf32> to vector<64x16xbf16>
    %167 = vector.extract_strided_slice %139 {offsets = [0, 64], sizes = [16, 8], strides = [1, 1]} : vector<16x96xbf16> to vector<16x8xbf16>
    %168 = vector.extract_strided_slice %166 {offsets = [0, 0], sizes = [16, 16], strides = [1, 1]} : vector<64x16xbf16> to vector<16x16xbf16>
    %cst_71 = arith.constant dense<0.000000e+00> : vector<16x8xf32>
    %169 = tpu.matmul %168, %167, %cst_71 {dimension_numbers = #tpu.dot_dimension_numbers<[1], [0], [0], [1], [0, 0, 1, 1], [], []>} : vector<16x16xbf16>, vector<16x8xbf16>, vector<16x8xf32> -> vector<16x8xf32>
    %170 = vector.extract_strided_slice %139 {offsets = [0, 72], sizes = [16, 8], strides = [1, 1]} : vector<16x96xbf16> to vector<16x8xbf16>
    %171 = vector.extract_strided_slice %166 {offsets = [16, 0], sizes = [16, 16], strides = [1, 1]} : vector<64x16xbf16> to vector<16x16xbf16>
    %cst_72 = arith.constant dense<0.000000e+00> : vector<16x8xf32>
    %172 = tpu.matmul %171, %170, %cst_72 {dimension_numbers = #tpu.dot_dimension_numbers<[1], [0], [0], [1], [0, 0, 1, 1], [], []>} : vector<16x16xbf16>, vector<16x8xbf16>, vector<16x8xf32> -> vector<16x8xf32>
    %173 = vector.extract_strided_slice %139 {offsets = [0, 80], sizes = [16, 8], strides = [1, 1]} : vector<16x96xbf16> to vector<16x8xbf16>
    %174 = vector.extract_strided_slice %166 {offsets = [32, 0], sizes = [16, 16], strides = [1, 1]} : vector<64x16xbf16> to vector<16x16xbf16>
    %cst_73 = arith.constant dense<0.000000e+00> : vector<16x8xf32>
    %175 = tpu.matmul %174, %173, %cst_73 {dimension_numbers = #tpu.dot_dimension_numbers<[1], [0], [0], [1], [0, 0, 1, 1], [], []>} : vector<16x16xbf16>, vector<16x8xbf16>, vector<16x8xf32> -> vector<16x8xf32>
    %176 = vector.extract_strided_slice %139 {offsets = [0, 88], sizes = [16, 8], strides = [1, 1]} : vector<16x96xbf16> to vector<16x8xbf16>
    %177 = vector.extract_strided_slice %166 {offsets = [48, 0], sizes = [16, 16], strides = [1, 1]} : vector<64x16xbf16> to vector<16x16xbf16>
    %cst_74 = arith.constant dense<0.000000e+00> : vector<16x8xf32>
    %178 = tpu.matmul %177, %176, %cst_74 {dimension_numbers = #tpu.dot_dimension_numbers<[1], [0], [0], [1], [0, 0, 1, 1], [], []>} : vector<16x16xbf16>, vector<16x8xbf16>, vector<16x8xf32> -> vector<16x8xf32>
    %179 = tpu.concatenate %169, %172, %175, %178 in 1 : vector<16x8xf32>, vector<16x8xf32>, vector<16x8xf32>, vector<16x8xf32> -> vector<16x32xf32>
    %180 = arith.truncf %179 : vector<16x32xf32> to vector<16x32xbf16>
    %c0_75 = arith.constant 0 : index
    %c0_76 = arith.constant 0 : index
    %181 = vector.load %arg19[%c0_75, %c0_76] : memref<32x32xbf16, #tpu.memory_space<vmem>>, vector<32x32xbf16>
    %cst_77 = arith.constant dense<0.000000e+00> : vector<16x32xf32>
    %182 = tpu.matmul %180, %181, %cst_77 {dimension_numbers = #tpu.dot_dimension_numbers<[1], [0], [0], [1], [0, 0, 1, 1], [], []>} : vector<16x32xbf16>, vector<32x32xbf16>, vector<16x32xf32> -> vector<16x32xf32>
    %c0_78 = arith.constant 0 : index
    %c0_79 = arith.constant 0 : index
    %183 = vector.load %arg20[%c0_78, %c0_79] : memref<1x32xf32, #tpu.memory_space<vmem>>, vector<1x32xf32>
    %184 = vector.broadcast %183 : vector<1x32xf32> to vector<16x32xf32>
    %185 = arith.addf %182, %184 : vector<16x32xf32>
    %186 = arith.addf %132, %185 : vector<16x32xf32>
    %c0_80 = arith.constant 0 : index
    %c0_81 = arith.constant 0 : index
    %187 = vector.load %arg21[%c0_80, %c0_81] : memref<1x32xf32, #tpu.memory_space<vmem>>, vector<1x32xf32>
    %c0_82 = arith.constant 0 : index
    %c0_83 = arith.constant 0 : index
    %188 = vector.load %arg22[%c0_82, %c0_83] : memref<1x32xf32, #tpu.memory_space<vmem>>, vector<1x32xf32>
    %cst_84 = arith.constant dense<0.000000e+00> : vector<16xf32>
    %189 = vector.multi_reduction <add>, %186, %cst_84 [1] : vector<16x32xf32> to vector<16xf32>
    %190 = vector.shape_cast %189 : vector<16xf32> to vector<16x1xf32>
    %cst_85 = arith.constant 3.200000e+01 : f32
    %191 = vector.broadcast %cst_85 : f32 to vector<16x1xf32>
    %192 = arith.divf %190, %191 : vector<16x1xf32>
    %193 = vector.broadcast %192 : vector<16x1xf32> to vector<16x32xf32>
    %194 = arith.subf %186, %193 : vector<16x32xf32>
    %195 = arith.mulf %194, %194 : vector<16x32xf32>
    %cst_86 = arith.constant dense<0.000000e+00> : vector<16xf32>
    %196 = vector.multi_reduction <add>, %195, %cst_86 [1] : vector<16x32xf32> to vector<16xf32>
    %197 = vector.shape_cast %196 : vector<16xf32> to vector<16x1xf32>
    %cst_87 = arith.constant 3.200000e+01 : f32
    %198 = vector.broadcast %cst_87 : f32 to vector<16x1xf32>
    %199 = arith.divf %197, %198 : vector<16x1xf32>
    %200 = vector.broadcast %192 : vector<16x1xf32> to vector<16x32xf32>
    %201 = arith.subf %186, %200 : vector<16x32xf32>
    %cst_88 = arith.constant 9.99999974E-6 : f32
    %202 = vector.broadcast %cst_88 : f32 to vector<16x1xf32>
    %203 = arith.addf %199, %202 : vector<16x1xf32>
    %204 = math.rsqrt %203 : vector<16x1xf32>
    %205 = vector.broadcast %204 : vector<16x1xf32> to vector<16x32xf32>
    %206 = arith.mulf %201, %205 : vector<16x32xf32>
    %207 = vector.broadcast %187 : vector<1x32xf32> to vector<16x32xf32>
    %208 = arith.mulf %206, %207 : vector<16x32xf32>
    %209 = vector.broadcast %188 : vector<1x32xf32> to vector<16x32xf32>
    %210 = arith.addf %208, %209 : vector<16x32xf32>
    %211 = arith.truncf %210 : vector<16x32xf32> to vector<16x32xbf16>
    %c0_89 = arith.constant 0 : index
    %c0_90 = arith.constant 0 : index
    %212 = vector.load %arg23[%c0_89, %c0_90] : memref<32x64xbf16, #tpu.memory_space<vmem>>, vector<32x64xbf16>
    %cst_91 = arith.constant dense<0.000000e+00> : vector<16x64xf32>
    %213 = tpu.matmul %211, %212, %cst_91 {dimension_numbers = #tpu.dot_dimension_numbers<[1], [0], [0], [1], [0, 0, 1, 1], [], []>} : vector<16x32xbf16>, vector<32x64xbf16>, vector<16x64xf32> -> vector<16x64xf32>
    %c0_92 = arith.constant 0 : index
    %c0_93 = arith.constant 0 : index
    %214 = vector.load %arg24[%c0_92, %c0_93] : memref<1x64xf32, #tpu.memory_space<vmem>>, vector<1x64xf32>
    %215 = vector.broadcast %214 : vector<1x64xf32> to vector<16x64xf32>
    %216 = arith.addf %213, %215 : vector<16x64xf32>
    %cst_94 = arith.constant 0.000000e+00 : f32
    %217 = vector.broadcast %cst_94 : f32 to vector<16x64xf32>
    %218 = arith.maximumf %216, %217 : vector<16x64xf32>
    %219 = arith.truncf %218 : vector<16x64xf32> to vector<16x64xbf16>
    %c0_95 = arith.constant 0 : index
    %c0_96 = arith.constant 0 : index
    %220 = vector.load %arg25[%c0_95, %c0_96] : memref<64x32xbf16, #tpu.memory_space<vmem>>, vector<64x32xbf16>
    %cst_97 = arith.constant dense<0.000000e+00> : vector<16x32xf32>
    %221 = tpu.matmul %219, %220, %cst_97 {dimension_numbers = #tpu.dot_dimension_numbers<[1], [0], [0], [1], [0, 0, 1, 1], [], []>} : vector<16x64xbf16>, vector<64x32xbf16>, vector<16x32xf32> -> vector<16x32xf32>
    %c0_98 = arith.constant 0 : index
    %c0_99 = arith.constant 0 : index
    %222 = vector.load %arg26[%c0_98, %c0_99] : memref<1x32xf32, #tpu.memory_space<vmem>>, vector<1x32xf32>
    %223 = vector.broadcast %222 : vector<1x32xf32> to vector<16x32xf32>
    %224 = arith.addf %221, %223 : vector<16x32xf32>
    %225 = arith.addf %210, %224 : vector<16x32xf32>
    %c0_100 = arith.constant 0 : index
    %c0_101 = arith.constant 0 : index
    %226 = vector.load %arg27[%c0_100, %c0_101] : memref<1x32xf32, #tpu.memory_space<vmem>>, vector<1x32xf32>
    %c0_102 = arith.constant 0 : index
    %c0_103 = arith.constant 0 : index
    %227 = vector.load %arg28[%c0_102, %c0_103] : memref<1x32xf32, #tpu.memory_space<vmem>>, vector<1x32xf32>
    %cst_104 = arith.constant dense<0.000000e+00> : vector<16xf32>
    %228 = vector.multi_reduction <add>, %225, %cst_104 [1] : vector<16x32xf32> to vector<16xf32>
    %229 = vector.shape_cast %228 : vector<16xf32> to vector<16x1xf32>
    %cst_105 = arith.constant 3.200000e+01 : f32
    %230 = vector.broadcast %cst_105 : f32 to vector<16x1xf32>
    %231 = arith.divf %229, %230 : vector<16x1xf32>
    %232 = vector.broadcast %231 : vector<16x1xf32> to vector<16x32xf32>
    %233 = arith.subf %225, %232 : vector<16x32xf32>
    %234 = arith.mulf %233, %233 : vector<16x32xf32>
    %cst_106 = arith.constant dense<0.000000e+00> : vector<16xf32>
    %235 = vector.multi_reduction <add>, %234, %cst_106 [1] : vector<16x32xf32> to vector<16xf32>
    %236 = vector.shape_cast %235 : vector<16xf32> to vector<16x1xf32>
    %cst_107 = arith.constant 3.200000e+01 : f32
    %237 = vector.broadcast %cst_107 : f32 to vector<16x1xf32>
    %238 = arith.divf %236, %237 : vector<16x1xf32>
    %239 = vector.broadcast %231 : vector<16x1xf32> to vector<16x32xf32>
    %240 = arith.subf %225, %239 : vector<16x32xf32>
    %cst_108 = arith.constant 9.99999974E-6 : f32
    %241 = vector.broadcast %cst_108 : f32 to vector<16x1xf32>
    %242 = arith.addf %238, %241 : vector<16x1xf32>
    %243 = math.rsqrt %242 : vector<16x1xf32>
    %244 = vector.broadcast %243 : vector<16x1xf32> to vector<16x32xf32>
    %245 = arith.mulf %240, %244 : vector<16x32xf32>
    %246 = vector.broadcast %226 : vector<1x32xf32> to vector<16x32xf32>
    %247 = arith.mulf %245, %246 : vector<16x32xf32>
    %248 = vector.broadcast %227 : vector<1x32xf32> to vector<16x32xf32>
    %249 = arith.addf %247, %248 : vector<16x32xf32>
    %250 = arith.truncf %249 : vector<16x32xf32> to vector<16x32xbf16>
    %c0_109 = arith.constant 0 : index
    %c0_110 = arith.constant 0 : index
    %251 = vector.load %arg29[%c0_109, %c0_110] : memref<32x32xbf16, #tpu.memory_space<vmem>>, vector<32x32xbf16>
    %cst_111 = arith.constant dense<0.000000e+00> : vector<16x32xf32>
    %252 = tpu.matmul %250, %251, %cst_111 {dimension_numbers = #tpu.dot_dimension_numbers<[1], [0], [0], [1], [0, 0, 1, 1], [], []>} : vector<16x32xbf16>, vector<32x32xbf16>, vector<16x32xf32> -> vector<16x32xf32>
    %c0_112 = arith.constant 0 : index
    %c0_113 = arith.constant 0 : index
    %253 = vector.load %arg30[%c0_112, %c0_113] : memref<1x32xf32, #tpu.memory_space<vmem>>, vector<1x32xf32>
    %254 = vector.broadcast %253 : vector<1x32xf32> to vector<16x32xf32>
    %255 = arith.addf %252, %254 : vector<16x32xf32>
    %c0_114 = arith.constant 0 : index
    %c0_115 = arith.constant 0 : index
    %256 = vector.load %arg31[%c0_114, %c0_115] : memref<16x32xf32, #tpu.memory_space<vmem>>, vector<16x32xf32>
    tpu.vector_store %arg31[%c0_114, %c0_115], %255 {strides = array<i32>} : memref<16x32xf32, #tpu.memory_space<vmem>>, vector<16x32xf32>,
    return
  }
  func.func @transform_0(%arg0: i32) -> (i32, i32) {
    %c0_i32 = arith.constant 0 : i32
    %c0_i32_0 = arith.constant 0 : i32
    return %arg0, %c0_i32 : i32, i32
  }
  func.func @transform_1(%arg0: i32) -> (i32, i32) {
    %c0_i32 = arith.constant 0 : i32
    %c0_i32_0 = arith.constant 0 : i32
    %c0_i32_1 = arith.constant 0 : i32
    return %c0_i32, %c0_i32_0 : i32, i32
  }
  func.func @transform_2(%arg0: i32) -> (i32, i32) {
    %c0_i32 = arith.constant 0 : i32
    %c0_i32_0 = arith.constant 0 : i32
    %c0_i32_1 = arith.constant 0 : i32
    return %c0_i32, %c0_i32_0 : i32, i32
  }
  func.func @transform_3(%arg0: i32) -> (i32, i32) {
    %c0_i32 = arith.constant 0 : i32
    %c0_i32_0 = arith.constant 0 : i32
    %c0_i32_1 = arith.constant 0 : i32
    return %c0_i32, %c0_i32_0 : i32, i32
  }
  func.func @transform_4(%arg0: i32) -> (i32, i32) {
    %c0_i32 = arith.constant 0 : i32
    %c0_i32_0 = arith.constant 0 : i32
    %c0_i32_1 = arith.constant 0 : i32
    return %c0_i32, %c0_i32_0 : i32, i32
  }
  func.func @transform_5(%arg0: i32) -> (i32, i32) {
    %c0_i32 = arith.constant 0 : i32
    %c0_i32_0 = arith.constant 0 : i32
    %c0_i32_1 = arith.constant 0 : i32
    return %c0_i32, %c0_i32_0 : i32, i32
  }
  func.func @transform_6(%arg0: i32) -> (i32, i32) {
    %c0_i32 = arith.constant 0 : i32
    %c0_i32_0 = arith.constant 0 : i32
    %c0_i32_1 = arith.constant 0 : i32
    return %c0_i32, %c0_i32_0 : i32, i32
  }
  func.func @transform_7(%arg0: i32) -> (i32, i32) {
    %c0_i32 = arith.constant 0 : i32
    %c0_i32_0 = arith.constant 0 : i32
    %c0_i32_1 = arith.constant 0 : i32
    return %c0_i32, %c0_i32_0 : i32, i32
  }
  func.func @transform_8(%arg0: i32) -> (i32, i32) {
    %c0_i32 = arith.constant 0 : i32
    %c0_i32_0 = arith.constant 0 : i32
    %c0_i32_1 = arith.constant 0 : i32
    return %c0_i32, %c0_i32_0 : i32, i32
  }
  func.func @transform_9(%arg0: i32) -> (i32, i32) {
    %c0_i32 = arith.constant 0 : i32
    %c0_i32_0 = arith.constant 0 : i32
    %c0_i32_1 = arith.constant 0 : i32
    return %c0_i32, %c0_i32_0 : i32, i32
  }
  func.func @transform_10(%arg0: i32) -> (i32, i32) {
    %c0_i32 = arith.constant 0 : i32
    %c0_i32_0 = arith.constant 0 : i32
    %c0_i32_1 = arith.constant 0 : i32
    return %c0_i32, %c0_i32_0 : i32, i32
  }
  func.func @transform_11(%arg0: i32) -> (i32, i32) {
    %c0_i32 = arith.constant 0 : i32
    %c0_i32_0 = arith.constant 0 : i32
    %c0_i32_1 = arith.constant 0 : i32
    return %c0_i32, %c0_i32_0 : i32, i32
  }
  func.func @transform_12(%arg0: i32) -> (i32, i32) {
    %c0_i32 = arith.constant 0 : i32
    %c0_i32_0 = arith.constant 0 : i32
    %c0_i32_1 = arith.constant 0 : i32
    return %c0_i32, %c0_i32_0 : i32, i32
  }
  func.func @transform_13(%arg0: i32) -> (i32, i32) {
    %c0_i32 = arith.constant 0 : i32
    %c0_i32_0 = arith.constant 0 : i32
    %c0_i32_1 = arith.constant 0 : i32
    return %c0_i32, %c0_i32_0 : i32, i32
  }
  func.func @transform_14(%arg0: i32) -> (i32, i32) {
    %c0_i32 = arith.constant 0 : i32
    %c0_i32_0 = arith.constant 0 : i32
    %c0_i32_1 = arith.constant 0 : i32
    return %c0_i32, %c0_i32_0 : i32, i32
  }
  func.func @transform_15(%arg0: i32) -> (i32, i32) {
    %c0_i32 = arith.constant 0 : i32
    %c0_i32_0 = arith.constant 0 : i32
    %c0_i32_1 = arith.constant 0 : i32
    return %c0_i32, %c0_i32_0 : i32, i32
  }
  func.func @transform_16(%arg0: i32) -> (i32, i32) {
    %c0_i32 = arith.constant 0 : i32
    %c0_i32_0 = arith.constant 0 : i32
    %c0_i32_1 = arith.constant 0 : i32
    return %c0_i32, %c0_i32_0 : i32, i32
  }
  func.func @transform_17(%arg0: i32) -> (i32, i32) {
    %c0_i32 = arith.constant 0 : i32
    %c0_i32_0 = arith.constant 0 : i32
    %c0_i32_1 = arith.constant 0 : i32
    return %c0_i32, %c0_i32_0 : i32, i32
  }
  func.func @transform_18(%arg0: i32) -> (i32, i32) {
    %c0_i32 = arith.constant 0 : i32
    %c0_i32_0 = arith.constant 0 : i32
    %c0_i32_1 = arith.constant 0 : i32
    return %c0_i32, %c0_i32_0 : i32, i32
  }
  func.func @transform_19(%arg0: i32) -> (i32, i32) {
    %c0_i32 = arith.constant 0 : i32
    %c0_i32_0 = arith.constant 0 : i32
    %c0_i32_1 = arith.constant 0 : i32
    return %c0_i32, %c0_i32_0 : i32, i32
  }
  func.func @transform_20(%arg0: i32) -> (i32, i32) {
    %c0_i32 = arith.constant 0 : i32
    %c0_i32_0 = arith.constant 0 : i32
    %c0_i32_1 = arith.constant 0 : i32
    return %c0_i32, %c0_i32_0 : i32, i32
  }
  func.func @transform_21(%arg0: i32) -> (i32, i32) {
    %c0_i32 = arith.constant 0 : i32
    %c0_i32_0 = arith.constant 0 : i32
    %c0_i32_1 = arith.constant 0 : i32
    return %c0_i32, %c0_i32_0 : i32, i32
  }
  func.func @transform_22(%arg0: i32) -> (i32, i32) {
    %c0_i32 = arith.constant 0 : i32
    %c0_i32_0 = arith.constant 0 : i32
    %c0_i32_1 = arith.constant 0 : i32
    return %c0_i32, %c0_i32_0 : i32, i32
  }
  func.func @transform_23(%arg0: i32) -> (i32, i32) {
    %c0_i32 = arith.constant 0 : i32
    %c0_i32_0 = arith.constant 0 : i32
    %c0_i32_1 = arith.constant 0 : i32
    return %c0_i32, %c0_i32_0 : i32, i32
  }
  func.func @transform_24(%arg0: i32) -> (i32, i32) {
    %c0_i32 = arith.constant 0 : i32
    %c0_i32_0 = arith.constant 0 : i32
    %c0_i32_1 = arith.constant 0 : i32
    return %c0_i32, %c0_i32_0 : i32, i32
  }
  func.func @transform_25(%arg0: i32) -> (i32, i32) {
    %c0_i32 = arith.constant 0 : i32
    %c0_i32_0 = arith.constant 0 : i32
    %c0_i32_1 = arith.constant 0 : i32
    return %c0_i32, %c0_i32_0 : i32, i32
  }
  func.func @transform_26(%arg0: i32) -> (i32, i32) {
    %c0_i32 = arith.constant 0 : i32
    %c0_i32_0 = arith.constant 0 : i32
    %c0_i32_1 = arith.constant 0 : i32
    return %c0_i32, %c0_i32_0 : i32, i32
  }
  func.func @transform_27(%arg0: i32) -> (i32, i32) {
    %c0_i32 = arith.constant 0 : i32
    %c0_i32_0 = arith.constant 0 : i32
    %c0_i32_1 = arith.constant 0 : i32
    return %c0_i32, %c0_i32_0 : i32, i32
  }
  func.func @transform_28(%arg0: i32) -> (i32, i32) {
    %c0_i32 = arith.constant 0 : i32
    %c0_i32_0 = arith.constant 0 : i32
    %c0_i32_1 = arith.constant 0 : i32
    return %c0_i32, %c0_i32_0 : i32, i32
  }
  func.func @transform_29(%arg0: i32) -> (i32, i32) {
    %c0_i32 = arith.constant 0 : i32
    %c0_i32_0 = arith.constant 0 : i32
    %c0_i32_1 = arith.constant 0 : i32
    return %c0_i32, %c0_i32_0 : i32, i32
  }
  func.func @transform_30(%arg0: i32) -> (i32, i32) {
    %c0_i32 = arith.constant 0 : i32
    %c0_i32_0 = arith.constant 0 : i32
    return %arg0, %c0_i32 : i32, i32
  }
}

</mosaic_0001>

<bundles_post_ra>
// kernel: latent_generator_forward.1
= control target key start
LH: loop header
LB: loop body
LE: loop exit
PB: predicated region body
PF: predicated region fallthrough
CT: control target
= control target key end

     0   :  { %s4051_s6 = smov 1   ;;  %s4052_s10 = smov 2   ;;  %s4762_s0 = inlined_call_operand.smem [shape: u32[31], index: -1, kind: input, shape index: {}] }
   0x1   :  { %s4114_s5 = sld [smem:[%s4762_s0]]   ;;  %s4053_s14 = smov 3  }
   0x2   :  { %s4119_s9 = sld [smem:[%s4762_s0 + %s4051_s6]]   ;;  %s4054_s18 = smov 4  }
   0x3   :  { %s4124_s13 = sld [smem:[%s4762_s0 + %s4052_s10]]   ;;  %s4055_s22 = smov 5  }
   0x4   :  { %s4129_s17 = sld [smem:[%s4762_s0 + %s4053_s14]]   ;;  %s4056_s26 = smov 6  }
   0x5   :  { %s4134_s21 = sld [smem:[%s4762_s0 + %s4054_s18]]   ;;  %s4057_s30 = smov 7  }
   0x6   :  { %s4139_s25 = sld [smem:[%s4762_s0 + %s4055_s22]]   ;;  %s4058_s4 = smov 8  }
   0x7   :  { %s4144_s29 = sld [smem:[%s4762_s0 + %s4056_s26]]   ;;  %s4059_s10 = smov 9  }
   0x8   :  { %s4149_s3 = sld [smem:[%s4762_s0 + %s4057_s30]]   ;;  %s4060_s15 = smov 10  }
   0x9   :  { %s4154_s8 = sld [smem:[%s4762_s0 + %s4058_s4]]   ;;  %s4061_s20 = smov 11  }
   0xa   :  { %s4159_s14 = sld [smem:[%s4762_s0 + %s4059_s10]]   ;;  %s4062_s26 = smov 12  }
   0xb   :  { %s4164_s19 = sld [smem:[%s4762_s0 + %s4060_s15]]   ;;  %s4063_s1 = smov 13  }
   0xc   :  { %s4169_s24 = sld [smem:[%s4762_s0 + %s4061_s20]]   ;;  %s4064_s7 = smov 14  }
   0xd   :  { %s4174_s30 = sld [smem:[%s4762_s0 + %s4062_s26]]   ;;  %s4065_s15 = smov 15  }
   0xe   :  { %s4179_s6 = sld [smem:[%s4762_s0 + %s4063_s1]]   ;;  %s4066_s22 = smov 16  }
   0xf   :  { %s4184_s12 = sld [smem:[%s4762_s0 + %s4064_s7]]   ;;  %s4067_s28 = smov 17  }
  0x10   :  { %s4189_s20 = sld [smem:[%s4762_s0 + %s4065_s15]]   ;;  %s4068_s7 = smov 18  }
  0x11   :  { %4781 = sst [smem:[#allocation20_spill]] %s4164_s19  ;;  %s4069_s15 = smov 19  }
  0x12   :  { %s4194_s27 = sld [smem:[%s4762_s0 + %s4066_s22]]   ;;  %s4070_s22 = smov 20  }
  0x13   :  { %4782 = sst [smem:[#allocation21_spill]] %s4174_s30 }
  0x14   :  { %s4199_s4 = sld [smem:[%s4762_s0 + %s4067_s28]]   ;;  %s4071_s28 = smov 21  }
  0x15   :  { %s4204_s30 = sld [smem:[%s4762_s0 + %s4068_s7]]   ;;  %s4072_s7 = smov 22  }
  0x16   :  { %s4209_s19 = sld [smem:[%s4762_s0 + %s4069_s15]]   ;;  %s4073_s15 = smov 23  }
  0x18   :  { %4783 = sst [smem:[#allocation22_spill]] %s4194_s27 }
  0x19   :  { %s4214_s27 = sld [smem:[%s4762_s0 + %s4070_s22]]   ;;  %s4074_s22 = smov 24  }
  0x1a   :  { %4784 = sst [smem:[#allocation23_spill]] %s4199_s4 }
  0x1b   :  { %4785 = sst [smem:[#allocation24_spill]] %s4204_s30 }
  0x1c   :  { %4786 = sst [smem:[#allocation25_spill]] %s4209_s19 }
  0x1d   :  { %s4219_s4 = sld [smem:[%s4762_s0 + %s4071_s28]]   ;;  %s4075_s28 = smov 25  }
  0x1e   :  { %s4224_s30 = sld [smem:[%s4762_s0 + %s4072_s7]]   ;;  %s4076_s7 = smov 26  }
  0x1f   :  { %4787 = sst [smem:[#allocation26_spill]] %s4214_s27 }
  0x20   :  { %s4229_s19 = sld [smem:[%s4762_s0 + %s4073_s15]]   ;;  %s4077_s15 = smov 27  }
  0x21   :  { %s4234_s27 = sld [smem:[%s4762_s0 + %s4074_s22]]   ;;  %s4078_s22 = smov 28  }
  0x23   :  { %4788 = sst [smem:[#allocation27_spill]] %s4219_s4 }
  0x24   :  { %4789 = sst [smem:[#allocation28_spill]] %s4224_s30 }
  0x25   :  { %s4239_s4 = sld [smem:[%s4762_s0 + %s4075_s28]]   ;;  %s4079_s28 = smov 29  }
  0x26   :  { %4790 = sst [smem:[#allocation29_spill]] %s4229_s19 }
  0x27   :  { %4791 = sst [smem:[#allocation30_spill]] %s4234_s27 }
  0x28   :  { %s4244_s30 = sld [smem:[%s4762_s0 + %s4076_s7]]   ;;  %s4080_s7 = smov 30  }
  0x29   :  { %s4249_s19 = sld [smem:[%s4762_s0 + %s4077_s15]]  }
  0x2a   :  { %s4254_s27 = sld [smem:[%s4762_s0 + %s4078_s22]]  }
  0x2b   :  { %4792 = sst [smem:[#allocation31_spill]] %s4239_s4 }
  0x2c   :  { %s4259_s4 = sld [smem:[%s4762_s0 + %s4079_s28]]  }
  0x2e   :  { %4793 = sst [smem:[#allocation32_spill]] %s4244_s30 }
  0x2f   :  { %s4264_s30 = sld [smem:[%s4762_s0 + %s4080_s7]]  }
  0x30   :  { %66 = vsyncpa [#allocation3], 0 }
  0x31   :  { %67 = vsyncpa [#allocation5], 0 }
  0x32   :  { %68 = vsyncpa [#allocation8], 0 }
  0x33   :  { %69 = vsyncpa [#allocation11], 0 }
  0x34   :  { %70 = vsyncpa [#allocation14], 0  ;;  %s4266_s15 = smov 0  }
  0x35 LB: > { %s4081_s16 = smov [#allocation4]   ;;  %s4771_s0 = sadd.s32 4294967295, %s4049_s15   ;;  %s4049_s15 = sphi %s4266_s15, %s76_s15  }
  0x36   : > { %s781_s18 = sshll.u32 %s4081_s16, 4  ;;  %p3186_p0 = scmp.ge.s32.totalorder %s4049_s15, 1  ;;  %s4280_s18 = int_to_ptr.vmem [resolvable:$true] %s781_s18 }
  0x37   : > { %p742_p1 = scmp.lt.s32.totalorder %s4049_s15, 3  ;;  %p4276_p2 = scmp.eq.s32.totalorder %s4771_s0, 0 }
  0x38   : > { %s4082_s26 = smov [#allocation7]   ;;  %s4083_s1 = smov [#allocation10]  }
  0x39   : > { %s4794_s22 = scalar_select %p4276_p2, 1, 0 }
  0x3a   : > { %p4282_p3 = pnand %p3186_p0, %p742_p1  ;;  %s803_s28 = sshll.u32 %s4082_s26, 4  ;;  %s4288_s28 = int_to_ptr.vmem [resolvable:$true] %s803_s28 }
  0x3b   : > { %s831_s2 = sshll.u32 %s4083_s1, 4  ;;  %s4084_s10 = smov [#allocation2]   ;;  %s4296_s2 = int_to_ptr.vmem [resolvable:$true] %s831_s2 }
  0x3c   : > { %s4795_s23 = scalar_select %p4282_p3, 1, 0 }
  0x3d   : > { %p3561_p4 = pneg %p4282_p3  ;;  %s767_s11 = sshll.u32 %s4084_s10, 4  ;;  %s4298_s11 = int_to_ptr.vmem [resolvable:$true] %s767_s11 }
  0x3e   : > { %s3799_s16 = scalar_lea.hbm %s4149_s3, 16 }
  0x3f   : > { %p4292_p5 = pnand %p4276_p2, %p3561_p4  ;;  %p3800_p6 = scmp.ne.s32.totalorder %s4149_s3, %s3799_s16 }
  0x40   : > { %p3806_p10 = scmp.lt.u32.totalorder %s3799_s16, %s4149_s3 }
  0x41   : > { %p4304_p7 = pneg %p4292_p5 }
  0x43   : > { %p3802_p8 = pnand %p4304_p7, %p3800_p6 }
  0x45   : > { %p3803_p9 = pneg %p3802_p8 }
  0x47   : > { %p3808_p11 = pnand %p3806_p10, %p3803_p9 }
  0x49   : > { %3811 = shalt.err (!%p3808_p11)
}
  0x4a   : > { %s3812_s1 = scalar_lea.vmem %s4280_s18, 16  ;;  %s3819_s10 = scalar_lea.vmem %s4280_s18, 32 }
  0x4b   : > { %p3813_p12 = scmp.ne.s32.totalorder %s4280_s18, %s3812_s1  ;;  %p3820_p1 = scmp.lt.s32.totalorder %s4280_s18, %s4280_s18 }
  0x4c   : > { %p3821_p4 = scmp.lt.s32.totalorder %s3819_s10, %s3812_s1 }
  0x4d   : > { %p3815_p13 = pnand %p3813_p12, %p4304_p7 }
  0x4e   : > { %p3822_p2 = por %p3821_p4, %p3820_p1 }
  0x4f   : > { %p3816_p0 = pneg %p3815_p13 }
  0x51   : > { %p3823_p6 = pnand %p3822_p2, %p3816_p0 }
  0x53   : > { %3826 = shalt.err (!%p3823_p6)
}
  0x54   : > { %3567 = dma.hbm_to_vmem [thread:$0]  (!%p4292_p5), %s4149_s3, 16, %s4280_s18, [#allocation5]  }
  0x55   : > { %s3827_s16 = scalar_lea.hbm %s4159_s14, 16 }
  0x56   : > { %p3828_p8 = scmp.ne.s32.totalorder %s4159_s14, %s3827_s16  ;;  %p3834_p11 = scmp.lt.u32.totalorder %s3827_s16, %s4159_s14 }
  0x58   : > { %p3830_p9 = pnand %p3828_p8, %p4304_p7 }
  0x5a   : > { %p3831_p10 = pneg %p3830_p9 }
  0x5c   : > { %p3836_p12 = pnand %p3834_p11, %p3831_p10 }
  0x5e   : > { %3839 = shalt.err (!%p3836_p12)
}
  0x5f   : > { %s3840_s1 = scalar_lea.vmem %s4288_s28, 16  ;;  %s3847_s10 = scalar_lea.vmem %s4288_s28, 32 }
  0x60   : > { %p3841_p2 = scmp.ne.s32.totalorder %s4288_s28, %s3840_s1  ;;  %p3848_p1 = scmp.lt.s32.totalorder %s4288_s28, %s4288_s28 }
  0x61   : > { %p3849_p4 = scmp.lt.s32.totalorder %s3847_s10, %s3840_s1 }
  0x62   : > { %p3843_p13 = pnand %p3841_p2, %p4304_p7 }
  0x63   : > { %p3850_p6 = por %p3849_p4, %p3848_p1 }
  0x64   : > { %p3844_p0 = pneg %p3843_p13 }
  0x66   : > { %p3851_p8 = pnand %p3850_p6, %p3844_p0 }
  0x68   : > { %3854 = shalt.err (!%p3851_p8)
}
  0x69   : > { %3573 = dma.hbm_to_vmem [thread:$0]  (!%p4292_p5), %s4159_s14, 16, %s4288_s28, [#allocation8]  }
  0x6a   : > { %s3855_s18 = scalar_lea.hbm %s4179_s6, 16 }
  0x6b   : > { %p3856_p9 = scmp.ne.s32.totalorder %s4179_s6, %s3855_s18  ;;  %p3862_p12 = scmp.lt.u32.totalorder %s3855_s18, %s4179_s6 }
  0x6d   : > { %p3858_p10 = pnand %p3856_p9, %p4304_p7 }
  0x6f   : > { %p3859_p11 = pneg %p3858_p10 }
  0x71   : > { %p3864_p2 = pnand %p3862_p12, %p3859_p11 }
  0x73   : > { %3867 = shalt.err (!%p3864_p2)
}
  0x74   : > { %s3868_s16 = scalar_lea.vmem %s4296_s2, 16  ;;  %s3875_s1 = scalar_lea.vmem %s4296_s2, 32 }
  0x75   : > { %p3869_p13 = scmp.ne.s32.totalorder %s4296_s2, %s3868_s16  ;;  %p3876_p4 = scmp.lt.s32.totalorder %s4296_s2, %s4296_s2 }
  0x76   : > { %p3877_p6 = scmp.lt.s32.totalorder %s3875_s1, %s3868_s16 }
  0x77   : > { %p3871_p0 = pnand %p3869_p13, %p4304_p7 }
  0x78   : > { %p3878_p8 = por %p3877_p6, %p3876_p4 }
  0x79   : > { %p3872_p1 = pneg %p3871_p0 }
  0x7b   : > { %p3879_p9 = pnand %p3878_p8, %p3872_p1 }
  0x7d   : > { %3882 = shalt.err (!%p3879_p9)
}
  0x7e   : > { %3579 = dma.hbm_to_vmem [thread:$0]  (!%p4292_p5), %s4179_s6, 16, %s4296_s2, [#allocation11]  }
  0x7f   : > { %s3883_s28 = scalar_lea.hbm %s4139_s25, 16 }
  0x80   : > { %p3884_p10 = scmp.ne.s32.totalorder %s4139_s25, %s3883_s28  ;;  %p3890_p2 = scmp.lt.u32.totalorder %s3883_s28, %s4139_s25 }
  0x82   : > { %p3886_p11 = pnand %p3884_p10, %p4304_p7 }
  0x84   : > { %p3887_p12 = pneg %p3886_p11 }
  0x86   : > { %p3892_p13 = pnand %p3890_p2, %p3887_p12 }
  0x88   : > { %3895 = shalt.err (!%p3892_p13)
}
  0x89   : > { %s3896_s10 = scalar_lea.vmem %s4298_s11, 16  ;;  %s3903_s18 = scalar_lea.vmem %s4298_s11, 32 }
  0x8a   : > { %p3897_p0 = scmp.ne.s32.totalorder %s4298_s11, %s3896_s10  ;;  %p3904_p6 = scmp.lt.s32.totalorder %s4298_s11, %s4298_s11 }
  0x8b   : > { %p3905_p8 = scmp.lt.s32.totalorder %s3903_s18, %s3896_s10 }
  0x8c   : > { %p3899_p1 = pnand %p3897_p0, %p4304_p7 }
  0x8d   : > { %p3906_p9 = por %p3905_p8, %p3904_p6 }
  0x8e   : > { %p3900_p4 = pneg %p3899_p1 }
  0x90   : > { %p3907_p10 = pnand %p3906_p9, %p3900_p4 }
  0x92   : > { %3910 = shalt.err (!%p3907_p10)
}
  0x93   : > { %3564 = dma.hbm_to_vmem [thread:$0]  (!%p4292_p5), %s4139_s25, 16, %s4298_s11, [#allocation3]  }
  0x94   : > { %s4085_s2 = smov [#allocation6]   ;;  %s4086_s1 = smov [#allocation9]  }
  0x95   : > { %s792_s16 = sshll.u32 %s4085_s2, 4  ;;  %s817_s28 = sshll.u32 %s4086_s1, 4  ;;  %s793_s16 = int_to_ptr.vmem [resolvable:$true] %s792_s16  ;;  %s818_s28 = int_to_ptr.vmem [resolvable:$true] %s817_s28 }
  0x96   : > { %s3911_s0 = scalar_lea.hbm %s4154_s8, 16 }
  0x97   : > { %p3912_p11 = scmp.ne.s32.totalorder %s4154_s8, %s3911_s0  ;;  %p3918_p13 = scmp.lt.u32.totalorder %s3911_s0, %s4154_s8 }
  0x99   : > { %p3914_p12 = pnand %p3912_p11, %p4304_p7 }
  0x9b   : > { %p3915_p2 = pneg %p3914_p12 }
  0x9d   : > { %p3920_p0 = pnand %p3918_p13, %p3915_p2 }
  0x9f   : > { %3923 = shalt.err (!%p3920_p0)
}
  0xa0   : > { %s3924_s10 = scalar_lea.vmem %s793_s16, 16  ;;  %s3931_s11 = scalar_lea.vmem %s793_s16, 32 }
  0xa1   : > { %p3925_p1 = scmp.ne.s32.totalorder %s793_s16, %s3924_s10  ;;  %p3932_p8 = scmp.lt.s32.totalorder %s793_s16, %s793_s16 }
  0xa2   : > { %p3933_p9 = scmp.lt.s32.totalorder %s3931_s11, %s3924_s10 }
  0xa3   : > { %p3927_p4 = pnand %p3925_p1, %p4304_p7 }
  0xa4   : > { %p3934_p10 = por %p3933_p9, %p3932_p8 }
  0xa5   : > { %p3928_p6 = pneg %p3927_p4 }
  0xa7   : > { %p3935_p3 = pnand %p3934_p10, %p3928_p6 }
  0xa9   : > { %3938 = shalt.err (!%p3935_p3)
}
  0xaa   : > { %3570 = dma.hbm_to_vmem [thread:$0]  (!%p4292_p5), %s4154_s8, 16, %s793_s16, [#allocation5]  }
  0xab   : > { %s3939_s0 = scalar_lea.hbm %s4169_s24, 16 }
  0xac   : > { %p3940_p11 = scmp.ne.s32.totalorder %s4169_s24, %s3939_s0  ;;  %p3946_p13 = scmp.lt.u32.totalorder %s3939_s0, %s4169_s24 }
  0xae   : > { %p3942_p12 = pnand %p3940_p11, %p4304_p7 }
  0xb0   : > { %p3943_p2 = pneg %p3942_p12 }
  0xb2   : > { %p3948_p0 = pnand %p3946_p13, %p3943_p2 }
  0xb4   : > { %3951 = shalt.err (!%p3948_p0)
}
  0xb5   : > { %s3952_s18 = scalar_lea.vmem %s818_s28, 16  ;;  %s3959_s2 = scalar_lea.vmem %s818_s28, 32 }
  0xb6   : > { %p3953_p3 = scmp.ne.s32.totalorder %s818_s28, %s3952_s18  ;;  %p3960_p6 = scmp.lt.s32.totalorder %s818_s28, %s818_s28 }
  0xb7   : > { %p3961_p8 = scmp.lt.s32.totalorder %s3959_s2, %s3952_s18 }
  0xb8   : > { %p3955_p1 = pnand %p3953_p3, %p4304_p7 }
  0xb9   : > { %p3962_p9 = por %p3961_p8, %p3960_p6 }
  0xba   : > { %p3956_p4 = pneg %p3955_p1 }
  0xbc   : > { %p3963_p10 = pnand %p3962_p9, %p3956_p4 }
  0xbe   : > { %3966 = shalt.err (!%p3963_p10)
}
  0xbf   : > { %3576 = dma.hbm_to_vmem [thread:$0]  (!%p4292_p5), %s4169_s24, 16, %s818_s28, [#allocation8]  }
  0xc0   : > { %s4087_s16 = smov [#allocation12]   ;;  %s4088_s10 = smov [#allocation13]  }
  0xc1   : > { %s842_s1 = sshll.u32 %s4087_s16, 4  ;;  %s853_s11 = sshll.u32 %s4088_s10, 4  ;;  %s843_s1 = int_to_ptr.vmem [resolvable:$true] %s842_s1  ;;  %s854_s11 = int_to_ptr.vmem [resolvable:$true] %s853_s11 }
  0xc2   : > { %s3967_s0 = scalar_lea.hbm %s4184_s12, 16 }
  0xc3   : > { %p3968_p11 = scmp.ne.s32.totalorder %s4184_s12, %s3967_s0  ;;  %p3974_p13 = scmp.lt.u32.totalorder %s3967_s0, %s4184_s12 }
  0xc5   : > { %p3970_p12 = pnand %p3968_p11, %p4304_p7 }
  0xc7   : > { %p3971_p2 = pneg %p3970_p12 }
  0xc9   : > { %p3976_p0 = pnand %p3974_p13, %p3971_p2 }
  0xcb   : > { %3979 = shalt.err (!%p3976_p0)
}
  0xcc   : > { %s3980_s18 = scalar_lea.vmem %s843_s1, 16  ;;  %s3987_s28 = scalar_lea.vmem %s843_s1, 32 }
  0xcd   : > { %p3981_p3 = scmp.ne.s32.totalorder %s843_s1, %s3980_s18  ;;  %p3988_p6 = scmp.lt.s32.totalorder %s843_s1, %s843_s1 }
  0xce   : > { %p3989_p8 = scmp.lt.s32.totalorder %s3987_s28, %s3980_s18 }
  0xcf   : > { %p3983_p1 = pnand %p3981_p3, %p4304_p7 }
  0xd0   : > { %p3990_p9 = por %p3989_p8, %p3988_p6 }
  0xd1   : > { %p3984_p4 = pneg %p3983_p1 }
  0xd3   : > { %p3991_p10 = pnand %p3990_p9, %p3984_p4 }
  0xd5   : > { %3994 = shalt.err (!%p3991_p10)
}
  0xd6   : > { %3582 = dma.hbm_to_vmem [thread:$0]  (!%p4292_p5), %s4184_s12, 16, %s843_s1, [#allocation11]  }
  0xd7   : > { %s3995_s2 = scalar_lea.hbm %s4189_s20, 16 }
  0xd8   : > { %p3996_p11 = scmp.ne.s32.totalorder %s4189_s20, %s3995_s2  ;;  %p4002_p13 = scmp.lt.u32.totalorder %s3995_s2, %s4189_s20 }
  0xda   : > { %p3998_p12 = pnand %p3996_p11, %p4304_p7 }
  0xdc   : > { %p3999_p2 = pneg %p3998_p12 }
  0xde   : > { %p4004_p0 = pnand %p4002_p13, %p3999_p2 }
  0xe0   : > { %4007 = shalt.err (!%p4004_p0)
}
  0xe1   : > { %s4008_s16 = scalar_lea.vmem %s854_s11, 16  ;;  %s4015_s10 = scalar_lea.vmem %s854_s11, 32 }
  0xe2   : > { %p4009_p3 = scmp.ne.s32.totalorder %s854_s11, %s4008_s16  ;;  %p4016_p6 = scmp.lt.s32.totalorder %s854_s11, %s854_s11 }
  0xe3   : > { %p4017_p8 = scmp.lt.s32.totalorder %s4015_s10, %s4008_s16 }
  0xe4   : > { %p4011_p1 = pnand %p4009_p3, %p4304_p7 }
  0xe5   : > { %p4018_p9 = por %p4017_p8, %p4016_p6 }
  0xe6   : > { %p4012_p4 = pneg %p4011_p1 }
  0xe8   : > { %p4019_p10 = pnand %p4018_p9, %p4012_p4 }
  0xea   : > { %4022 = shalt.err (!%p4019_p10)
}
  0xeb   : > { %3585 = dma.hbm_to_vmem [thread:$0]  (!%p4292_p5), %s4189_s20, 16, %s854_s11, [#allocation14]  }
  0xec   : > { %p4798_p11 = scmp.ne.s32.totalorder %s4795_s23, 0 }
  0xed   : > { %p4799_p12 = scmp.ne.s32.totalorder (!%p4798_p11), %s4794_s22, 0 }
  0xee   : > { %917 = sbr.rel (%p4798_p11) target bundleno = 5726 (0x165e), region = 140 }
  0xf5   : > { %4028 = dma.done.wait (%p4799_p12), [#allocation3], 16  }
  0xf6   : > { %4030 = vsyncadd (%p4799_p12), [#allocation3], 4294967280 }
  0xf7   : > { %4032 = dma.done.wait (%p4799_p12), [#allocation5], 32  }
  0xf8   : > { %4034 = vsyncadd (%p4799_p12), [#allocation5], 4294967264 }
  0xf9   : > { %4036 = dma.done.wait (%p4799_p12), [#allocation8], 32  }
  0xfa   : > { %4038 = vsyncadd (%p4799_p12), [#allocation8], 4294967264 }
  0xfb   : > { %4040 = dma.done.wait (%p4799_p12), [#allocation11], 32  }
  0xfc   : > { %4042 = vsyncadd (%p4799_p12), [#allocation11], 4294967264 }
  0xfd   : > { %4044 = dma.done.wait (%p4799_p12), [#allocation14], 16  }
  0xfe   : > { %4046 = vsyncadd (%p4799_p12), [#allocation14], 4294967280  ;;  %s4800_s23 = sadd.s32 4294967295, %s4049_s15   ;;  %v4089_v0 = vmov 0.0   ;;  %vm4090_vm0 = vmmov 0   ;;  %v3695_v1 = vld [vmem:[%s4124_s13] sm:$0xff]   ;;  %v1111_v39 = vlaneseq }
  0xff   : > { %s3205_s7 = sshll.u32 %s4800_s23, 1  ;;  %3345 = vmatprep.subr.bf16.mxu0 %v4089_v0  ;;  %3349 = vmatprep.mubr.msk.bf16.mxu0 %vm4090_vm0, %v4089_v0  ;;  %v3696_v2 = vld [vmem:[%s4124_s13 + $0x8] sm:$0xff]   ;;  %vm1062_vm1 = vcmask 261120   ;;  %v3697_v6 = vld [vmem:[%s4134_s21] sm:$0xff]   ;;  %s4091_s1 = smov 80   ;;  %vm1192_vm2 = vcmask 64512  }
 0x100   : > { %p1024_p5 = scmp.lt.s32.totalorder %s3205_s7, 3  ;;  %3353 = vmatprep.subr.bf16.mxu1 %v4089_v0  ;;  %3357 = vmatprep.mubr.msk.bf16.mxu1 %vm4090_vm0, %v4089_v0  ;;  %v3698_v7 = vld [vmem:[%s4134_s21 + $0x8] sm:$0xff]   ;;  %v3209_v8 = vld [vmem:[%s4129_s17] ss:$0 sm:$0xff]  ;;  %s4092_s11 = smov 96   ;;  %v1112_v40 = vshrl.u32 %v1111_v39, 7 }
 0x101   : > { %3346 = vmatpush3.bf16.msra.mxu0 %v3695_v1  ;;  %3354 = vmatpush3.bf16.msra.mxu1 %v3697_v6  ;;  %v1107_v12 = vld [vmem:[%s4119_s9] sm:$0xff]  ;;  %v1108_v14 = vld [vmem:[%s4119_s9 + $0x8] sm:$0xff]  ;;  %s4093_s0 = smov 120   ;;  %s4094_s18 = smov 88   ;;  %v1115_v41 = vand.u32 127, %v1111_v39  ;;  %vm1409_vm5 = vcmask 130048  }
 0x102   : > { %s4823_s7 = smov (!%p1024_p5, %s3205_s7), 3  ;;  %3347 = vmatprep.subr.bf16.mxu0 %v4089_v0  ;;  %3355 = vmatprep.subr.bf16.mxu1 %v4089_v0  ;;  %v3213_v20 = vld [vmem:[#allocation2] ss:$0 sm:$0xff]  ;;  %s4095_s28 = smov 112   ;;  %v1113_v42 = vadd.s32 8, %v1112_v40  ;;  %vm1718_vm6 = vcmask 195584  }
 0x103   : > { %s4773_s22 = sshll.u32 %s4823_s7, 3  ;;  %s4096_s2 = smov 72   ;;  %vm1116_vm3 = vcmp.le.s32.totalorder %v1115_v41, %v1112_v40  ;;  %v4098_v44 = vmov -1e+30   ;;  %vm1946_vm7 = vcmask 523264  }
 0x104   : > { %s1027_s26 = scalar_lea.vmem %s4114_s5, %s4773_s22  ;;  %s4097_s16 = smov 104   ;;  %vm1117_vm4 = vcmp.le.s32.totalorder %v1115_v41, %v1113_v42  ;;  %v4506_v45 = vsel %vm1116_vm3, 0.0, %v4098_v44 }
 0x105   : > { %v1036_v3 = vld [vmem:[%s1027_s26] sm:$0xff]  ;;  %v1037_v4 = vld [vmem:[%s1027_s26 + $0x8] sm:$0xff]  ;;  %3348 = vmatpush3.bf16.msra.mxu0 %v3696_v2  ;;  %3356 = vmatpush3.bf16.msra.mxu1 %v3698_v7  ;;  %v4508_v49 = vsel %vm1117_vm4, 0.0, %v4098_v44  ;;  %s4780_s10 = smov 56   ;;  %s4776_s23 = smov 64  }
 0x106   : > { %v1038_v5 = vpack.c.bf16 %v1037_v4, %v1036_v3  ;;  %3361 = vmatprep.subr.bf16.mxu0 %v4089_v0  ;;  %3367 = vmatprep.subr.bf16.mxu1 %v4089_v0  ;;  %s4775_s26 = smov 48   ;;  %s4774_s22 = smov 40  }
 0x108   : > { %3350 = vmatmul.mubr.msk.bf16.vlgmr.msra.gmra.mrb[0].mxu0 %vm1062_vm1, %v1038_v5 }
 0x109   : > { %3363 = vmatprep.mubr.msk.bf16.mxu0 %vm4090_vm0, %v4089_v0 }
 0x1db   : > { %v1100_v9 = vpop.f32.mrb[0].mxu0 }
 0x1dc   : > { %v1101_v10 = vadd.f32 %v3209_v8, %v1100_v9  ;;  %v3351_v11 = vpop.f32.mrb[1].mxu0 }
 0x1dd   : > { %v1103_v13 = vpop.f32.mrb[2].mxu0 }
 0x1de   : > { %v1104_v15 = vadd.f32 %v3209_v8, %v1103_v13  ;;  %v3352_v16 = vpop.f32.mrb[3].mxu0  ;;  %v4460_v17 = vadd.f32 %v1107_v12, %v1101_v10 }
 0x1e0   : > { %v4462_v18 = vadd.f32 %v1108_v14, %v1104_v15 }
 0x1e2   : > { %v1120_v19 = vpack.c.bf16 %v4462_v18, %v4460_v17 }
 0x1e4   : > { %3358 = vmatmul.mubr.msk.bf16.vlgmr.msra.gmra.mrb[0].mxu1 %vm1062_vm1, %v1120_v19 }
 0x1e5   : > { %3369 = vmatprep.mubr.msk.bf16.mxu1 %vm4090_vm0, %v4089_v0 }
 0x2b7   : > { %v1181_v21 = vpop.f32.mrb[0].mxu1 }
 0x2b8   : > { %v3359_v22 = vpop.f32.mrb[1].mxu1  ;;  %v1182_v24 = vadd.f32 %v3213_v20, %v1181_v21 }
 0x2b9   : > { %v1184_v23 = vpop.f32.mrb[2].mxu1 }
 0x2ba   : > { %v1185_v25 = vadd.f32 %v3213_v20, %v1184_v23  ;;  %v3360_v26 = vpop.f32.mrb[3].mxu1 }
 0x2bc   : > { %v4469_v27 = vpack.c.bf16 %v1185_v25, %v1182_v24 }
 0x2be   : > { %1293 = vrot.lane.b32.xlu1 %v4469_v27, %s4091_s1  ;;  %1190 = vrot.lane.b32.xlu0 %v4469_v27, %s4092_s11 }
 0x2c2   : > { %1240 = vrot.lane.b32.xlu1 %v4469_v27, %s4093_s0  ;;  %1242 = vrot.lane.b32.xlu0 %v4469_v27, %s4094_s18 }
 0x2c6   : > { %1291 = vrot.lane.b32.xlu1 %v4469_v27, %s4095_s28  ;;  %1344 = vrot.lane.b32.xlu0 %v4469_v27, %s4096_s2 }
 0x2ca   : > { %1342 = vrot.lane.b32.xlu0 %v4469_v27, %s4097_s16 }
 0x330   : > { %v1191_v28 = vpop.permute.xlu0 %1190  ;;  %v1294_v30 = vpop.permute.xlu1 %1293 }
 0x331   : > { %v1197_v29 = vsel %vm1192_vm2, %v1191_v28, 0  ;;  %v1299_v33 = vsel %vm1192_vm2, %v1294_v30, 0 }
 0x332   : > { %3362 = vmatpush3.bf16.xpose.msra.mxu0 %v1197_v29 }
 0x333   : > { %3373 = vmatprep.subr.bf16.mxu0 %v4089_v0 }
 0x334   : > { %v1243_v31 = vpop.permute.xlu0 %1242  ;;  %v1241_v34 = vpop.permute.xlu1 %1240 }
 0x335   : > { %v1248_v32 = vsel %vm1192_vm2, %v1243_v31, 0 }
 0x336   : > { %3368 = vmatpush3.bf16.xpose.msra.mxu1 %v1248_v32 }
 0x337   : > { %3379 = vmatprep.subr.bf16.mxu1 %v4089_v0 }
 0x338   : > { %v1345_v35 = vpop.permute.xlu0 %1344  ;;  %v1292_v37 = vpop.permute.xlu1 %1291 }
 0x339   : > { %3364 = vmatmul.mubr.msk.bf16.vlgmr.msra.gmra.mrb[4].mxu0 %vm1192_vm2, %v4469_v27  ;;  %v1350_v36 = vsel %vm1192_vm2, %v1345_v35, 0 }
 0x33a   : > { %3374 = vmatpush3.bf16.xpose.msra.mxu0 %v1299_v33  ;;  %3375 = vmatprep.mubr.msk.bf16.mxu0 %vm4090_vm0, %v4089_v0 }
 0x33b   : > { %3385 = vmatprep.subr.bf16.mxu0 %v4089_v0 }
 0x33c   : > { %v1343_v38 = vpop.permute.xlu0 %1342 }
 0x33d   : > { %3370 = vmatmul.mubr.msk.bf16.vlgmr.msra.gmra.mrb[4].mxu1 %vm1192_vm2, %v1241_v34 }
 0x33e   : > { %3380 = vmatpush3.bf16.xpose.msra.mxu1 %v1350_v36  ;;  %3381 = vmatprep.mubr.msk.bf16.mxu1 %vm4090_vm0, %v4089_v0 }
 0x33f   : > { %3391 = vmatprep.subr.bf16.mxu1 %v4089_v0 }
 0x341   : > { %3376 = vmatmul.mubr.msk.bf16.vlgmr.msra.gmra.mrb[8].mxu0 %vm1192_vm2, %v1292_v37 }
 0x342   : > { %3387 = vmatprep.mubr.msk.bf16.mxu0 %vm4090_vm0, %v4089_v0 }
 0x345   : > { %3382 = vmatmul.mubr.msk.bf16.vlgmr.msra.gmra.mrb[8].mxu1 %vm1192_vm2, %v1343_v38 }
 0x346   : > { %3393 = vmatprep.mubr.msk.bf16.mxu1 %vm4090_vm0, %v4089_v0 }
 0x40c   : > { %v1233_v43 = vpop.f32.mrb[4].mxu0 }
 0x40d   : > { %v1393_v46 = vmul.f32 0.35355338, %v1233_v43  ;;  %v3365_v47 = vpop.f32.mrb[5].mxu0 }
 0x40e   : > { %v1236_v48 = vpop.f32.mrb[6].mxu0 }
 0x40f   : > { %v1394_v50 = vmul.f32 0.35355338, %v1236_v48  ;;  %v3366_v51 = vpop.f32.mrb[7].mxu0  ;;  %v1401_v52 = vadd.f32 %v1393_v46, %v4506_v45 }
 0x410   : > { %v1284_v53 = vpop.f32.mrb[4].mxu1 }
 0x411   : > { %v1395_v54 = vmul.f32 0.35355338, %v1284_v53  ;;  %v3371_v55 = vpop.f32.mrb[5].mxu1  ;;  %v1410_v56 = vsel %vm1409_vm5, %v1401_v52, -inf  ;;  %v1402_v57 = vadd.f32 %v1394_v50, %v4508_v49 }
 0x412   : > { %v1287_v58 = vpop.f32.mrb[6].mxu1  ;;  %1411 = vmax.xlane.f32.xlu1 %v1410_v56 }
 0x413   : > { %v1396_v59 = vmul.f32 0.35355338, %v1287_v58  ;;  %v3372_v60 = vpop.f32.mrb[7].mxu1  ;;  %v1413_v61 = vsel %vm1409_vm5, %v1402_v57, -inf  ;;  %v1403_v62 = vadd.f32 %v1395_v54, %v4506_v45 }
 0x414   : > { %1414 = vmax.xlane.f32.xlu0 %v1413_v61  ;;  %v1335_v63 = vpop.f32.mrb[8].mxu0 }
 0x415   : > { %v1397_v1 = vmul.f32 0.35355338, %v1335_v63  ;;  %v3377_v2 = vpop.f32.mrb[9].mxu0  ;;  %v1404_v3 = vadd.f32 %v1396_v59, %v4508_v49  ;;  %v1416_v8 = vsel %vm1409_vm5, %v1403_v62, -inf }
 0x416   : > { %v1338_v4 = vpop.f32.mrb[10].mxu0 }
 0x417   : > { %v1398_v5 = vmul.f32 0.35355338, %v1338_v4  ;;  %v3378_v6 = vpop.f32.mrb[11].mxu0  ;;  %v1419_v7 = vsel %vm1409_vm5, %v1404_v3, -inf  ;;  %v1405_v9 = vadd.f32 %v1397_v1, %v4506_v45 }
 0x418   : > { %v1386_v10 = vpop.f32.mrb[8].mxu1  ;;  %1420 = vmax.xlane.f32.xlu1 %v1419_v7  ;;  %1417 = vmax.xlane.f32.xlu0 %v1416_v8 }
 0x419   : > { %v1399_v11 = vmul.f32 0.35355338, %v1386_v10  ;;  %v3383_v12 = vpop.f32.mrb[9].mxu1  ;;  %v1406_v13 = vadd.f32 %v1398_v5, %v4508_v49  ;;  %v1422_v19 = vsel %vm1409_vm5, %v1405_v9, -inf }
 0x41a   : > { %v1389_v14 = vpop.f32.mrb[10].mxu1 }
 0x41b   : > { %v1400_v15 = vmul.f32 0.35355338, %v1389_v14  ;;  %v3384_v16 = vpop.f32.mrb[11].mxu1  ;;  %v1425_v20 = vsel %vm1409_vm5, %v1406_v13, -inf  ;;  %v1407_v21 = vadd.f32 %v1399_v11, %v4506_v45 }
 0x41c   : > { %1423 = vmax.xlane.f32.xlu0 %v1422_v19  ;;  %1426 = vmax.xlane.f32.xlu1 %v1425_v20 }
 0x41d   : > { %v1408_v22 = vadd.f32 %v1400_v15, %v4508_v49  ;;  %v1428_v23 = vsel %vm1409_vm5, %v1407_v21, -inf }
 0x41f   : > { %v1431_v24 = vsel %vm1409_vm5, %v1408_v22, -inf }
 0x420   : > { %1429 = vmax.xlane.f32.xlu0 %v1428_v23  ;;  %1432 = vmax.xlane.f32.xlu1 %v1431_v24 }
 0x431   : > { %1549 = vrot.lane.b32.xlu1 %v4469_v27, %s4780_s10  ;;  %s4804_s10 = sld [smem:[#allocation23_spill]] }
 0x436   : > { %1502 = vrot.lane.b32.xlu0 %v4469_v27, %s4776_s23  ;;  %s4777_s23 = smov 24  }
 0x49f   : > { %v1412_v25 = vpop.xlane.xlu1 %1411 }
 0x4a0   : > { %v1434_v26 = vsub.f32 %v1401_v52, %v1412_v25 }
 0x4a1   : > { %v1415_v28 = vpop.xlane.xlu0 %1414 }
 0x4a2   : > { %v1442_v29 = vmul.f32 1.442695, %v1434_v26  ;;  %v1435_v30 = vsub.f32 %v1402_v57, %v1415_v28 }
 0x4a4   : > { %3719 = vpow2.f32 %v1442_v29  ;;  %v1444_v31 = vmul.f32 1.442695, %v1435_v30 }
 0x4a5   : > { %v1421_v32 = vpop.xlane.xlu1 %1420  ;;  %v1418_v33 = vpop.xlane.xlu0 %1417 }
 0x4a6   : > { %3721 = vpow2.f32 %v1444_v31  ;;  %v1437_v34 = vsub.f32 %v1404_v3, %v1421_v32  ;;  %v1436_v35 = vsub.f32 %v1403_v62, %v1418_v33 }
 0x4a8   : > { %v1448_v36 = vmul.f32 1.442695, %v1437_v34  ;;  %v1446_v37 = vmul.f32 1.442695, %v1436_v35 }
 0x4a9   : > { %v1424_v38 = vpop.xlane.xlu0 %1423  ;;  %v1427_v39 = vpop.xlane.xlu1 %1426 }
 0x4aa   : > { %3723 = vpow2.f32 %v1448_v36  ;;  %v1438_v40 = vsub.f32 %v1405_v9, %v1424_v38  ;;  %v1439_v41 = vsub.f32 %v1406_v13, %v1427_v39 }
 0x4ab   : > { %3725 = vpow2.f32 %v1446_v37 }
 0x4ac   : > { %v1450_v42 = vmul.f32 1.442695, %v1438_v40  ;;  %v1452_v43 = vmul.f32 1.442695, %v1439_v41 }
 0x4ad   : > { %v1430_v44 = vpop.xlane.xlu0 %1429  ;;  %v1433_v46 = vpop.xlane.xlu1 %1432 }
 0x4ae   : > { %v3720_v47 = vpop.eup %3719  ;;  %3727 = vpow2.f32 %v1450_v42  ;;  %v1440_v48 = vsub.f32 %v1407_v21, %v1430_v44  ;;  %v1441_v50 = vsub.f32 %v1408_v22, %v1433_v46  ;;  %v3699_v42 = vld [vmem:[%s4144_s29] sm:$0xff]  }
 0x4af   : > { %3729 = vpow2.f32 %v1452_v43  ;;  %v1458_v51 = vsel %vm1409_vm5, %v3720_v47, 0.0 }
 0x4b0   : > { %v3722_v52 = vpop.eup %3721  ;;  %v1454_v53 = vmul.f32 1.442695, %v1440_v48  ;;  %v1456_v54 = vmul.f32 1.442695, %v1441_v50  ;;  %1459 = vadd.xlane.f32.xlu0 %v1458_v51 }
 0x4b1   : > { %v1503_v55 = vpop.permute.xlu0 %1502  ;;  %v1550_v56 = vpop.permute.xlu1 %1549  ;;  %v1461_v57 = vsel %vm1409_vm5, %v3722_v52, 0.0 }
 0x4b2   : > { %3731 = vpow2.f32 %v1454_v53  ;;  %3386 = vmatpush3.bf16.msra.mxu0 %v1503_v55  ;;  %1462 = vadd.xlane.f32.xlu1 %v1461_v57 }
 0x4b3   : > { %3733 = vpow2.f32 %v1456_v54  ;;  %3392 = vmatpush3.bf16.msra.mxu1 %v1550_v56  ;;  %3397 = vmatprep.subr.bf16.mxu0 %v4089_v0 }
 0x4b4   : > { %v3724_v58 = vpop.eup %3723  ;;  %3403 = vmatprep.subr.bf16.mxu1 %v4089_v0 }
 0x4b5   : > { %v3726_v59 = vpop.eup %3725  ;;  %v1467_v60 = vsel %vm1409_vm5, %v3724_v58, 0.0 }
 0x4b6   : > { %v1464_v61 = vsel %vm1409_vm5, %v3726_v59, 0.0  ;;  %1468 = vadd.xlane.f32.xlu1 %v1467_v60 }
 0x4b7   : > { %1465 = vadd.xlane.f32.xlu0 %v1464_v61 }
 0x4b8   : > { %v3728_v62 = vpop.eup %3727 }
 0x4b9   : > { %v3730_v63 = vpop.eup %3729  ;;  %v1470_v1 = vsel %vm1409_vm5, %v3728_v62, 0.0 }
 0x4ba   : > { %v1473_v2 = vsel %vm1409_vm5, %v3730_v63, 0.0 }
 0x4bb   : > { %1471 = vadd.xlane.f32.xlu0 %v1470_v1  ;;  %1474 = vadd.xlane.f32.xlu1 %v1473_v2 }
 0x4bc   : > { %v3732_v3 = vpop.eup %3731 }
 0x4bd   : > { %v3734_v4 = vpop.eup %3733  ;;  %v1476_v5 = vsel %vm1409_vm5, %v3732_v3, 0.0 }
 0x4be   : > { %v1479_v6 = vsel %vm1409_vm5, %v3734_v4, 0.0 }
 0x4bf   : > { %1477 = vadd.xlane.f32.xlu0 %v1476_v5  ;;  %1480 = vadd.xlane.f32.xlu1 %v1479_v6 }
 0x4d0   : > { %1596 = vrot.lane.b32.xlu1 %v4469_v27, %s4775_s26  ;;  %s4778_s26 = smov 16  }
 0x4d5   : > { %1643 = vrot.lane.b32.xlu0 %v4469_v27, %s4774_s22  ;;  %s4779_s22 = smov 8  }
 0x53d   : > { %v1460_v7 = vpop.xlane.xlu0 %1459 }
 0x53e   : > { %3735 = vrcp.f32 %v1460_v7 }
 0x53f   : > { %v1463_v8 = vpop.xlane.xlu1 %1462 }
 0x540   : > { %3737 = vrcp.f32 %v1463_v8 }
 0x543   : > { %v1469_v9 = vpop.xlane.xlu1 %1468 }
 0x544   : > { %v1466_v10 = vpop.xlane.xlu0 %1465  ;;  %3739 = vrcp.f32 %v1469_v9 }
 0x545   : > { %3741 = vrcp.f32 %v1466_v10 }
 0x548   : > { %v3736_v11 = vpop.eup %3735  ;;  %v1472_v12 = vpop.xlane.xlu0 %1471 }
 0x549   : > { %v1475_v13 = vpop.xlane.xlu1 %1474  ;;  %3743 = vrcp.f32 %v1472_v12  ;;  %v1490_v15 = vmul.f32 %v3736_v11, %v3720_v47  ;;  %v3700_v47 = vld [vmem:[%s4144_s29 + $0x8] sm:$0xff]  }
 0x54a   : > { %v3738_v14 = vpop.eup %3737  ;;  %3745 = vrcp.f32 %v1475_v13 }
 0x54b   : > { %v1491_v16 = vmul.f32 %v3738_v14, %v3722_v52 }
 0x54c   : > { %v1478_v19 = vpop.xlane.xlu0 %1477 }
 0x54d   : > { %v1481_v20 = vpop.xlane.xlu1 %1480  ;;  %3747 = vrcp.f32 %v1478_v19  ;;  %v1498_v27 = vpack.c.bf16 %v1491_v16, %v1490_v15  ;;  %v3225_v15 = vld [vmem:[#allocation4] ss:$0 sm:$0xff] }
 0x54e   : > { %v3740_v21 = vpop.eup %3739  ;;  %3749 = vrcp.f32 %v1481_v20 }
 0x54f   : > { %v3742_v22 = vpop.eup %3741  ;;  %v1493_v23 = vmul.f32 %v3740_v21, %v3724_v58  ;;  %3388 = vmatmul.mubr.msk.bf16.vlgmr.msra.gmra.mrb[12].mxu0 %vm1409_vm5, %v1498_v27 }
 0x550   : > { %v1492_v24 = vmul.f32 %v3742_v22, %v3726_v59  ;;  %3399 = vmatprep.mubr.msk.bf16.mxu0 %vm4090_vm0, %v4089_v0  ;;  %v1644_v31 = vpop.permute.xlu0 %1643 }
 0x551   : > { %v1597_v25 = vpop.permute.xlu1 %1596 }
 0x552   : > { %3398 = vmatpush3.bf16.msra.mxu0 %v1597_v25  ;;  %v1499_v26 = vpack.c.bf16 %v1493_v23, %v1492_v24 }
 0x553   : > { %3409 = vmatprep.subr.bf16.mxu0 %v4089_v0  ;;  %v3744_v28 = vpop.eup %3743 }
 0x554   : > { %v3746_v29 = vpop.eup %3745  ;;  %v1494_v30 = vmul.f32 %v3744_v28, %v3728_v62  ;;  %3394 = vmatmul.mubr.msk.bf16.vlgmr.msra.gmra.mrb[12].mxu1 %vm1409_vm5, %v1499_v26 }
 0x555   : > { %v1495_v32 = vmul.f32 %v3746_v29, %v3730_v63  ;;  %3404 = vmatpush3.bf16.msra.mxu1 %v1644_v31  ;;  %3405 = vmatprep.mubr.msk.bf16.mxu1 %vm4090_vm0, %v4089_v0 }
 0x556   : > { %3417 = vmatprep.subr.bf16.mxu1 %v4089_v0 }
 0x557   : > { %v3748_v33 = vpop.eup %3747  ;;  %v1500_v34 = vpack.c.bf16 %v1495_v32, %v1494_v30 }
 0x558   : > { %v3750_v35 = vpop.eup %3749  ;;  %v1496_v36 = vmul.f32 %v3748_v33, %v3732_v3 }
 0x559   : > { %v1497_v37 = vmul.f32 %v3750_v35, %v3734_v4  ;;  %3400 = vmatmul.mubr.msk.bf16.vlgmr.msra.gmra.mrb[16].mxu0 %vm1409_vm5, %v1500_v34 }
 0x55a   : > { %3413 = vmatprep.mubr.msk.bf16.mxu0 %vm4090_vm0, %v4089_v0  ;;  %3410 = vmatpush3.bf16.msra.mxu0 %v3699_v42 }
 0x55b   : > { %v1501_v38 = vpack.c.bf16 %v1497_v37, %v1496_v36  ;;  %3411 = vmatprep.subr.bf16.mxu0 %v4089_v0 }
 0x55d   : > { %3406 = vmatmul.mubr.msk.bf16.vlgmr.msra.gmra.mrb[16].mxu1 %vm1409_vm5, %v1501_v38 }
 0x55e   : > { %3421 = vmatprep.mubr.msk.bf16.mxu1 %vm4090_vm0, %v4089_v0  ;;  %3412 = vmatpush3.bf16.msra.mxu0 %v3700_v47 }
 0x55f   : > { %3425 = vmatprep.subr.bf16.mxu0 %v4089_v0 }
 0x622   : > { %v1542_v39 = vpop.f32.mrb[12].mxu0 }
 0x623   : > { %v3389_v40 = vpop.f32.mrb[13].mxu0 }
 0x624   : > { %v1545_v41 = vpop.f32.mrb[14].mxu0 }
 0x625   : > { %v3390_v43 = vpop.f32.mrb[15].mxu0 }
 0x627   : > { %v1589_v44 = vpop.f32.mrb[12].mxu1 }
 0x628   : > { %v3395_v46 = vpop.f32.mrb[13].mxu1 }
 0x629   : > { %v1592_v48 = vpop.f32.mrb[14].mxu1 }
 0x62a   : > { %v3665_v50 = vpack.i.bf16 %v1592_v48, %v1589_v44  ;;  %v3396_v51 = vpop.f32.mrb[15].mxu1 }
 0x62c   : > { %v1636_v52 = vpop.f32.mrb[16].mxu0  ;;  %3666 = vrot.lane.b32.xlu1 %v3665_v50, %s4779_s22  ;;  %v3229_v50 = vld [vmem:[#allocation6] ss:$0 sm:$0xff]  ;;  %s4803_s22 = sld [smem:[#allocation22_spill]] }
 0x62d   : > { %v3401_v53 = vpop.f32.mrb[17].mxu0 }
 0x62e   : > { %v1639_v54 = vpop.f32.mrb[18].mxu0 }
 0x62f   : > { %v3670_v55 = vpack.i.bf16 %v1639_v54, %v1636_v52  ;;  %v3402_v56 = vpop.f32.mrb[19].mxu0  ;;  %v3230_v54 = vld [vmem:[#allocation7] ss:$0 sm:$0xff] }
 0x630   : > { %v1683_v57 = vpop.f32.mrb[16].mxu1 }
 0x631   : > { %v3407_v58 = vpop.f32.mrb[17].mxu1  ;;  %3671 = vrot.lane.b32.xlu0 %v3670_v55, %s4778_s26  ;;  %s4802_s26 = sld [smem:[#allocation21_spill]] }
 0x632   : > { %v1686_v59 = vpop.f32.mrb[18].mxu1 }
 0x633   : > { %v3675_v60 = vpack.i.bf16 %v1686_v59, %v1683_v57  ;;  %v3408_v61 = vpop.f32.mrb[19].mxu1 }
 0x634   : > { %v3231_v61 = vld [vmem:[#allocation9] ss:$0 sm:$0xff] }
 0x635   : > { %3676 = vrot.lane.b32.xlu1 %v3675_v60, %s4777_s23  ;;  %s4801_s23 = sld [smem:[#allocation20_spill]] }
 0x637   : > { %v3703_v38 = vld [vmem:[%s4802_s26] sm:$0xff]   ;;  %v3705_v59 = vld [vmem:[%s4802_s26 + $0x10] sm:$0xff]   ;;  %v3706_v60 = vld [vmem:[%s4802_s26 + $0x18] sm:$0xff]  }
 0x63b   : > { %v3701_v36 = vld [vmem:[%s4801_s23] sm:$0xff]   ;;  %v3702_v37 = vld [vmem:[%s4801_s23 + $0x8] sm:$0xff]  }
 0x63c   : > { %3418 = vmatpush3.bf16.msra.mxu1 %v3701_v36 }
 0x63d   : > { %3419 = vmatprep.subr.bf16.mxu1 %v4089_v0 }
 0x640   : > { %3420 = vmatpush3.bf16.msra.mxu1 %v3702_v37 }
 0x641   : > { %3437 = vmatprep.subr.bf16.mxu1 %v4089_v0 }
 0x69e   : > { %v3667_v62 = vpop.permute.xlu1 %3666 }
 0x69f   : > { %v3669_v1 = vunpack.i.h.bf16 %v3667_v62  ;;  %v3668_v2 = vunpack.i.l.bf16 %v3667_v62 }
 0x6a1   : > { %v1714_v6 = vsel %vm1192_vm2, %v1542_v39, %v3668_v2  ;;  %v1715_v7 = vsel %vm1192_vm2, %v1545_v41, %v3669_v1  ;;  %v3704_v39 = vld [vmem:[%s4802_s26 + $0x8] sm:$0xff]  }
 0x6a3   : > { %v3672_v63 = vpop.permute.xlu0 %3671 }
 0x6a4   : > { %v3674_v3 = vunpack.i.h.bf16 %v3672_v63  ;;  %v3673_v4 = vunpack.i.l.bf16 %v3672_v63 }
 0x6a6   : > { %v1717_v10 = vsel %vm1409_vm5, %v1715_v7, %v3674_v3  ;;  %v1716_v11 = vsel %vm1409_vm5, %v1714_v6, %v3673_v4 }
 0x6a7   : > { %v3677_v5 = vpop.permute.xlu1 %3676 }
 0x6a8   : > { %v3679_v8 = vunpack.i.h.bf16 %v3677_v5  ;;  %v3678_v9 = vunpack.i.l.bf16 %v3677_v5 }
 0x6aa   : > { %v1719_v12 = vsel %vm1718_vm6, %v1716_v11, %v3678_v9  ;;  %v1720_v13 = vsel %vm1718_vm6, %v1717_v10, %v3679_v8  ;;  %v3235_v8 = vld [vmem:[#allocation10] ss:$0 sm:$0xff] }
 0x6ab   : > { %v1721_v14 = vpack.c.bf16 %v1720_v13, %v1719_v12 }
 0x6ad   : > { %3414 = vmatmul.mubr.msk.bf16.vlgmr.msra.gmra.mrb[20].mxu0 %vm1062_vm1, %v1721_v14 }
 0x6ae   : > { %3433 = vmatprep.mubr.msk.bf16.mxu0 %vm4090_vm0, %v4089_v0  ;;  %3426 = vmatpush3.bf16.msra.mxu0 %v3703_v38  ;;  %v3241_v38 = vld [vmem:[#allocation12] ss:$0 sm:$0xff] }
 0x6af   : > { %3427 = vmatprep.subr.bf16.mxu0 %v4089_v0 }
 0x6b2   : > { %3428 = vmatpush3.bf16.msra.mxu0 %v3704_v39 }
 0x6b3   : > { %3429 = vmatprep.subr.bf16.mxu0 %v4089_v0 }
 0x6b6   : > { %3430 = vmatpush3.bf16.msra.mxu0 %v3705_v59 }
 0x6b7   : > { %3431 = vmatprep.subr.bf16.mxu0 %v4089_v0 }
 0x6ba   : > { %3432 = vmatpush3.bf16.msra.mxu0 %v3706_v60 }
 0x6bb   : > { %3451 = vmatprep.subr.bf16.mxu0 %v4089_v0 }
 0x780   : > { %v1782_v16 = vpop.f32.mrb[20].mxu0 }
 0x781   : > { %v1783_v19 = vadd.f32 %v3225_v15, %v1782_v16  ;;  %v3415_v20 = vpop.f32.mrb[21].mxu0 }
 0x782   : > { %v1785_v27 = vpop.f32.mrb[22].mxu0 }
 0x783   : > { %v1786_v21 = vadd.f32 %v3225_v15, %v1785_v27  ;;  %v3416_v22 = vpop.f32.mrb[23].mxu0  ;;  %v1789_v23 = vadd.f32 %v1783_v19, %v4460_v17 }
 0x785   : > { %v1793_v24 = vsel %vm1062_vm1, %v1789_v23, 0.0  ;;  %v1790_v25 = vadd.f32 %v1786_v21, %v4462_v18 }
 0x786   : > { %1794 = vadd.xlane.f32.xlu0 %v1793_v24 }
 0x787   : > { %v1796_v26 = vsel %vm1062_vm1, %v1790_v25, 0.0 }
 0x788   : > { %1797 = vadd.xlane.f32.xlu1 %v1796_v26 }
 0x813   : > { %v1795_v28 = vpop.xlane.xlu0 %1794 }
 0x814   : > { %v1800_v29 = vmul.f32 0.03125, %v1795_v28 }
 0x815   : > { %v1798_v30 = vpop.xlane.xlu1 %1797 }
 0x816   : > { %v1802_v31 = vsub.f32 %v1789_v23, %v1800_v29  ;;  %v1801_v32 = vmul.f32 0.03125, %v1798_v30 }
 0x818   : > { %v1803_v33 = vsub.f32 %v1790_v25, %v1801_v32  ;;  %v1804_v34 = vmul.f32 %v1802_v31, %v1802_v31  ;;  %v3708_v32 = vld [vmem:[%s4803_s22 + $0x8] sm:$0xff]  }
 0x81a   : > { %v1806_v17 = vsel %vm1062_vm1, %v1804_v34, 0.0  ;;  %v1805_v35 = vmul.f32 %v1803_v33, %v1803_v33 }
 0x81b   : > { %1807 = vadd.xlane.f32.xlu0 %v1806_v17 }
 0x81c   : > { %v1809_v18 = vsel %vm1062_vm1, %v1805_v35, 0.0 }
 0x81f   : > { %1810 = vadd.xlane.f32.xlu0 %v1809_v18 }
 0x8a8   : > { %v1808_v40 = vpop.xlane.xlu0 %1807 }
 0x8a9   : > { %v1812_v41 = vmul.f32 0.03125, %v1808_v40 }
 0x8ab   : > { %v1814_v42 = vadd.f32 1e-05, %v1812_v41 }
 0x8ac   : > { %v1811_v43 = vpop.xlane.xlu0 %1810 }
 0x8ad   : > { %3751 = vrsqrt.f32 %v1814_v42  ;;  %v1813_v44 = vmul.f32 0.03125, %v1811_v43  ;;  %v3242_v43 = vld [vmem:[#allocation13] ss:$0 sm:$0xff] }
 0x8af   : > { %v1815_v46 = vadd.f32 1e-05, %v1813_v44 }
 0x8b1   : > { %3753 = vrsqrt.f32 %v1815_v46 }
 0x8b7   : > { %v3752_v47 = vpop.eup %3751 }
 0x8b8   : > { %v1818_v48 = vmul.f32 %v3752_v47, %v1802_v31  ;;  %v3707_v31 = vld [vmem:[%s4803_s22] sm:$0xff]  }
 0x8ba   : > { %v1826_v52 = vmul.f32 %v3229_v50, %v1818_v48 }
 0x8bb   : > { %v3754_v51 = vpop.eup %3753 }
 0x8bc   : > { %v1819_v53 = vmul.f32 %v3754_v51, %v1803_v33  ;;  %v1834_v56 = vadd.f32 %v3230_v54, %v1826_v52 }
 0x8be   : > { %v1827_v55 = vmul.f32 %v3229_v50, %v1819_v53  ;;  %v3243_v50 = vld [vmem:[%s4804_s10] ss:$0 sm:$0xff]  ;;  %s4812_s10 = smov 24  }
 0x8c0   : > { %v1835_v57 = vadd.f32 %v3230_v54, %v1827_v55 }
 0x8c2   : > { %v1836_v58 = vpack.c.bf16 %v1835_v57, %v1834_v56 }
 0x8c4   : > { %3422 = vmatmul.mubr.msk.bf16.vlgmr.msra.gmra.mrb[20].mxu1 %vm1062_vm1, %v1836_v58 }
 0x8c5   : > { %3441 = vmatprep.mubr.msk.bf16.mxu1 %vm4090_vm0, %v4089_v0  ;;  %3438 = vmatpush3.bf16.msra.mxu1 %v3707_v31 }
 0x8c6   : > { %3439 = vmatprep.subr.bf16.mxu1 %v4089_v0 }
 0x8c9   : > { %3440 = vmatpush3.bf16.msra.mxu1 %v3708_v32 }
 0x8ca   : > { %3445 = vmatprep.subr.bf16.mxu1 %v4089_v0 }
 0x997   : > { %v1897_v62 = vpop.f32.mrb[20].mxu1 }
 0x998   : > { %v1898_v63 = vadd.f32 %v3231_v61, %v1897_v62  ;;  %v3423_v1 = vpop.f32.mrb[21].mxu1 }
 0x999   : > { %v1900_v2 = vpop.f32.mrb[22].mxu1 }
 0x99a   : > { %v1901_v3 = vadd.f32 %v3231_v61, %v1900_v2  ;;  %v3424_v4 = vpop.f32.mrb[23].mxu1  ;;  %v1904_v5 = vmax.f32 %v1898_v63, 0.0 }
 0x99c   : > { %v1905_v6 = vmax.f32 %v1901_v3, 0.0 }
 0x99e   : > { %v1906_v7 = vpack.c.bf16 %v1905_v6, %v1904_v5 }
 0x9a0   : > { %3434 = vmatmul.mubr.msk.bf16.vlgmr.msra.gmra.mrb[24].mxu0 %vm1946_vm7, %v1906_v7 }
 0x9a1   : > { %3453 = vmatprep.mubr.msk.bf16.mxu0 %vm4090_vm0, %v4089_v0 }
 0xa73   : > { %v1984_v9 = vpop.f32.mrb[24].mxu0 }
 0xa74   : > { %v1985_v10 = vadd.f32 %v3235_v8, %v1984_v9  ;;  %v3435_v11 = vpop.f32.mrb[25].mxu0 }
 0xa75   : > { %v1987_v12 = vpop.f32.mrb[26].mxu0 }
 0xa76   : > { %v1988_v13 = vadd.f32 %v3235_v8, %v1987_v12  ;;  %v3436_v14 = vpop.f32.mrb[27].mxu0  ;;  %v1991_v15 = vadd.f32 %v1985_v10, %v1834_v56 }
 0xa78   : > { %v1995_v16 = vsel %vm1062_vm1, %v1991_v15, 0.0  ;;  %v1992_v19 = vadd.f32 %v1988_v13, %v1835_v57 }
 0xa79   : > { %1996 = vadd.xlane.f32.xlu1 %v1995_v16 }
 0xa7a   : > { %v1998_v20 = vsel %vm1062_vm1, %v1992_v19, 0.0 }
 0xa7b   : > { %1999 = vadd.xlane.f32.xlu0 %v1998_v20 }
 0xb06   : > { %v1997_v27 = vpop.xlane.xlu1 %1996 }
 0xb07   : > { %v2001_v21 = vmul.f32 0.03125, %v1997_v27 }
 0xb08   : > { %v2000_v22 = vpop.xlane.xlu0 %1999 }
 0xb09   : > { %v2003_v23 = vsub.f32 %v1991_v15, %v2001_v21  ;;  %v2002_v24 = vmul.f32 0.03125, %v2000_v22 }
 0xb0b   : > { %v2004_v25 = vsub.f32 %v1992_v19, %v2002_v24  ;;  %v2005_v26 = vmul.f32 %v2003_v23, %v2003_v23 }
 0xb0d   : > { %v2007_v28 = vsel %vm1062_vm1, %v2005_v26, 0.0  ;;  %v2006_v29 = vmul.f32 %v2004_v25, %v2004_v25 }
 0xb0e   : > { %2008 = vadd.xlane.f32.xlu1 %v2007_v28 }
 0xb0f   : > { %v2010_v30 = vsel %vm1062_vm1, %v2006_v29, 0.0 }
 0xb10   : > { %2011 = vadd.xlane.f32.xlu0 %v2010_v30 }
 0xb9b   : > { %v2009_v33 = vpop.xlane.xlu1 %2008 }
 0xb9c   : > { %v2013_v34 = vmul.f32 0.03125, %v2009_v33 }
 0xb9d   : > { %v2012_v17 = vpop.xlane.xlu0 %2011 }
 0xb9e   : > { %v2015_v35 = vadd.f32 1e-05, %v2013_v34  ;;  %v2014_v18 = vmul.f32 0.03125, %v2012_v17 }
 0xba0   : > { %3755 = vrsqrt.f32 %v2015_v35  ;;  %v2016_v36 = vadd.f32 1e-05, %v2014_v18 }
 0xba2   : > { %3757 = vrsqrt.f32 %v2016_v36 }
 0xbaa   : > { %v3756_v37 = vpop.eup %3755 }
 0xbab   : > { %v2019_v39 = vmul.f32 %v3756_v37, %v2003_v23 }
 0xbac   : > { %v3758_v40 = vpop.eup %3757 }
 0xbad   : > { %v2027_v41 = vmul.f32 %v3241_v38, %v2019_v39  ;;  %v2020_v42 = vmul.f32 %v3758_v40, %v2004_v25 }
 0xbaf   : > { %v2028_v44 = vmul.f32 %v3241_v38, %v2020_v42  ;;  %v4606_v46 = vadd.f32 %v3242_v43, %v2027_v41 }
 0xbb1   : > { %v4608_v47 = vadd.f32 %v3242_v43, %v2028_v44 }
 0xbb3   : > { %v2037_v48 = vpack.c.bf16 %v4608_v47, %v4606_v46 }
 0xbb5   : > { %3442 = vmatmul.mubr.msk.bf16.vlgmr.msra.gmra.mrb[24].mxu1 %vm1062_vm1, %v2037_v48 }
 0xbb6   : > { %3447 = vmatprep.mubr.msk.bf16.mxu1 %vm4090_vm0, %v4089_v0 }
 0xc88   : > { %v2098_v51 = vpop.f32.mrb[24].mxu1 }
 0xc89   : > { %v3443_v52 = vpop.f32.mrb[25].mxu1  ;;  %v2099_v54 = vadd.f32 %v3243_v50, %v2098_v51 }
 0xc8a   : > { %v2101_v53 = vpop.f32.mrb[26].mxu1 }
 0xc8b   : > { %v2102_v55 = vadd.f32 %v3243_v50, %v2101_v53  ;;  %v3444_v56 = vpop.f32.mrb[27].mxu1 }
 0xc8d   : > { %v4616_v57 = vpack.c.bf16 %v2102_v55, %v2099_v54 }
 0xc8f   : > { %2158 = vrot.lane.b32.xlu0 %v4616_v57, %s4094_s18  ;;  %2107 = vrot.lane.b32.xlu1 %v4616_v57, %s4092_s11  ;;  %s4806_s11 = smov 64   ;;  %s4808_s18 = smov 40  }
 0xc93   : > { %2260 = vrot.lane.b32.xlu0 %v4616_v57, %s4096_s2  ;;  %2209 = vrot.lane.b32.xlu1 %v4616_v57, %s4091_s1  ;;  %s4805_s1 = smov 56   ;;  %s4810_s2 = smov 8  }
 0xc97   : > { %2258 = vrot.lane.b32.xlu0 %v4616_v57, %s4097_s16  ;;  %2156 = vrot.lane.b32.xlu1 %v4616_v57, %s4093_s0  ;;  %s4807_s0 = smov 48   ;;  %s4811_s16 = smov 16  }
 0xc9b   : > { %2207 = vrot.lane.b32.xlu1 %v4616_v57, %s4095_s28  ;;  %s4809_s28 = sld [smem:[#allocation24_spill]] }
 0xd01   : > { %v2159_v58 = vpop.permute.xlu0 %2158  ;;  %v2108_v59 = vpop.permute.xlu1 %2107 }
 0xd02   : > { %v2164_v60 = vsel %vm1192_vm2, %v2159_v58, 0  ;;  %v2113_v61 = vsel %vm1192_vm2, %v2108_v59, 0 }
 0xd03   : > { %3446 = vmatpush3.bf16.xpose.msra.mxu1 %v2113_v61  ;;  %3452 = vmatpush3.bf16.xpose.msra.mxu0 %v2164_v60 }
 0xd04   : > { %3457 = vmatprep.subr.bf16.mxu1 %v4089_v0  ;;  %3463 = vmatprep.subr.bf16.mxu0 %v4089_v0 }
 0xd05   : > { %v2210_v62 = vpop.permute.xlu1 %2209  ;;  %v2261_v63 = vpop.permute.xlu0 %2260 }
 0xd06   : > { %v2266_v2 = vsel %vm1192_vm2, %v2261_v63, 0  ;;  %v2215_v3 = vsel %vm1192_vm2, %v2210_v62, 0 }
 0xd09   : > { %v2157_v1 = vpop.permute.xlu1 %2156  ;;  %v2259_v4 = vpop.permute.xlu0 %2258 }
 0xd0a   : > { %3448 = vmatmul.mubr.msk.bf16.vlgmr.msra.gmra.mrb[28].mxu1 %vm1192_vm2, %v4616_v57  ;;  %3454 = vmatmul.mubr.msk.bf16.vlgmr.msra.gmra.mrb[28].mxu0 %vm1192_vm2, %v2157_v1 }
 0xd0b   : > { %3458 = vmatpush3.bf16.xpose.msra.mxu1 %v2215_v3  ;;  %3464 = vmatpush3.bf16.xpose.msra.mxu0 %v2266_v2 }
 0xd0c   : > { %3459 = vmatprep.mubr.msk.bf16.mxu1 %vm4090_vm0, %v4089_v0  ;;  %3465 = vmatprep.mubr.msk.bf16.mxu0 %vm4090_vm0, %v4089_v0 }
 0xd0d   : > { %3469 = vmatprep.subr.bf16.mxu1 %v4089_v0  ;;  %3475 = vmatprep.subr.bf16.mxu0 %v4089_v0  ;;  %v2208_v5 = vpop.permute.xlu1 %2207 }
 0xd12   : > { %3460 = vmatmul.mubr.msk.bf16.vlgmr.msra.gmra.mrb[32].mxu1 %vm1192_vm2, %v2208_v5  ;;  %3466 = vmatmul.mubr.msk.bf16.vlgmr.msra.gmra.mrb[32].mxu0 %vm1192_vm2, %v2259_v4 }
 0xd13   : > { %3471 = vmatprep.mubr.msk.bf16.mxu1 %vm4090_vm0, %v4089_v0  ;;  %3477 = vmatprep.mubr.msk.bf16.mxu0 %vm4090_vm0, %v4089_v0 }
 0xddd   : > { %v2149_v6 = vpop.f32.mrb[28].mxu1  ;;  %v2200_v7 = vpop.f32.mrb[28].mxu0 }
 0xdde   : > { %v2309_v8 = vmul.f32 0.35355338, %v2149_v6  ;;  %v3449_v9 = vpop.f32.mrb[29].mxu1  ;;  %v3455_v10 = vpop.f32.mrb[29].mxu0  ;;  %v2311_v11 = vmul.f32 0.35355338, %v2200_v7 }
 0xddf   : > { %v2152_v12 = vpop.f32.mrb[30].mxu1  ;;  %v2203_v13 = vpop.f32.mrb[30].mxu0 }
 0xde0   : > { %v2310_v14 = vmul.f32 0.35355338, %v2152_v12  ;;  %v2312_v15 = vmul.f32 0.35355338, %v2203_v13  ;;  %v3450_v16 = vpop.f32.mrb[31].mxu1  ;;  %v3456_v19 = vpop.f32.mrb[31].mxu0  ;;  %v2317_v20 = vadd.f32 %v2309_v8, %v4506_v45  ;;  %v2319_v23 = vadd.f32 %v2311_v11, %v4506_v45 }
 0xde2   : > { %v2325_v27 = vsel %vm1409_vm5, %v2317_v20, -inf  ;;  %v2318_v21 = vadd.f32 %v2310_v14, %v4508_v49  ;;  %v2320_v22 = vadd.f32 %v2312_v15, %v4508_v49  ;;  %v2331_v17 = vsel %vm1409_vm5, %v2319_v23, -inf }
 0xde3   : > { %2326 = vmax.xlane.f32.xlu1 %v2325_v27 }
 0xde4   : > { %v2328_v24 = vsel %vm1409_vm5, %v2318_v21, -inf  ;;  %v2334_v31 = vsel %vm1409_vm5, %v2320_v22, -inf }
 0xde5   : > { %2329 = vmax.xlane.f32.xlu0 %v2328_v24  ;;  %v2251_v25 = vpop.f32.mrb[32].mxu1  ;;  %v2302_v26 = vpop.f32.mrb[32].mxu0 }
 0xde6   : > { %v2313_v28 = vmul.f32 0.35355338, %v2251_v25  ;;  %v3461_v29 = vpop.f32.mrb[33].mxu1  ;;  %v3467_v30 = vpop.f32.mrb[33].mxu0  ;;  %v2315_v32 = vmul.f32 0.35355338, %v2302_v26 }
 0xde7   : > { %v2254_v33 = vpop.f32.mrb[34].mxu1  ;;  %2335 = vmax.xlane.f32.xlu1 %v2334_v31  ;;  %v2305_v34 = vpop.f32.mrb[34].mxu0 }
 0xde8   : > { %v2314_v35 = vmul.f32 0.35355338, %v2254_v33  ;;  %v2316_v18 = vmul.f32 0.35355338, %v2305_v34  ;;  %v3462_v36 = vpop.f32.mrb[35].mxu1  ;;  %v3468_v37 = vpop.f32.mrb[35].mxu0  ;;  %v2321_v38 = vadd.f32 %v2313_v28, %v4506_v45  ;;  %v2323_v42 = vadd.f32 %v2315_v32, %v4506_v45 }
 0xde9   : > { %2332 = vmax.xlane.f32.xlu0 %v2331_v17 }
 0xdea   : > { %v2322_v39 = vadd.f32 %v2314_v35, %v4508_v49  ;;  %v2337_v40 = vsel %vm1409_vm5, %v2321_v38, -inf  ;;  %v2324_v43 = vadd.f32 %v2316_v18, %v4508_v49  ;;  %v2343_v44 = vsel %vm1409_vm5, %v2323_v42, -inf }
 0xdec   : > { %v2340_v41 = vsel %vm1409_vm5, %v2322_v39, -inf  ;;  %v2346_v48 = vsel %vm1409_vm5, %v2324_v43, -inf }
 0xded   : > { %2338 = vmax.xlane.f32.xlu0 %v2337_v40  ;;  %2341 = vmax.xlane.f32.xlu1 %v2340_v41 }
 0xdf1   : > { %2344 = vmax.xlane.f32.xlu0 %v2343_v44  ;;  %2347 = vmax.xlane.f32.xlu1 %v2346_v48 }
 0xe02   : > { %2464 = vrot.lane.b32.xlu1 %v4616_v57, %s4805_s1  ;;  %s4813_s1 = sld [smem:[#allocation25_spill]] }
 0xe07   : > { %2417 = vrot.lane.b32.xlu0 %v4616_v57, %s4806_s11  ;;  %s4814_s11 = sld [smem:[#allocation28_spill]] }
 0xe70   : > { %v2327_v50 = vpop.xlane.xlu1 %2326 }
 0xe71   : > { %v2349_v51 = vsub.f32 %v2317_v20, %v2327_v50 }
 0xe72   : > { %v2330_v52 = vpop.xlane.xlu0 %2329 }
 0xe73   : > { %v2357_v45 = vmul.f32 1.442695, %v2349_v51  ;;  %v2350_v53 = vsub.f32 %v2318_v21, %v2330_v52 }
 0xe74   : > { %v2336_v49 = vpop.xlane.xlu1 %2335 }
 0xe75   : > { %3759 = vpow2.f32 %v2357_v45  ;;  %v2359_v54 = vmul.f32 1.442695, %v2350_v53  ;;  %v2352_v55 = vsub.f32 %v2320_v22, %v2336_v49 }
 0xe76   : > { %v2333_v56 = vpop.xlane.xlu0 %2332 }
 0xe77   : > { %3761 = vpow2.f32 %v2359_v54  ;;  %v2363_v58 = vmul.f32 1.442695, %v2352_v55  ;;  %v2351_v59 = vsub.f32 %v2319_v23, %v2333_v56 }
 0xe79   : > { %3763 = vpow2.f32 %v2363_v58  ;;  %v2361_v60 = vmul.f32 1.442695, %v2351_v59 }
 0xe7a   : > { %v2339_v61 = vpop.xlane.xlu0 %2338  ;;  %v2342_v62 = vpop.xlane.xlu1 %2341 }
 0xe7b   : > { %3765 = vpow2.f32 %v2361_v60  ;;  %v2353_v63 = vsub.f32 %v2321_v38, %v2339_v61  ;;  %v2354_v1 = vsub.f32 %v2322_v39, %v2342_v62 }
 0xe7d   : > { %v2365_v2 = vmul.f32 1.442695, %v2353_v63  ;;  %v2367_v3 = vmul.f32 1.442695, %v2354_v1  ;;  %v3709_v63 = vld [vmem:[%s4809_s28] sm:$0xff]  }
 0xe7e   : > { %v2345_v4 = vpop.xlane.xlu0 %2344  ;;  %v2348_v5 = vpop.xlane.xlu1 %2347 }
 0xe7f   : > { %v3760_v6 = vpop.eup %3759  ;;  %3767 = vpow2.f32 %v2365_v2  ;;  %v2355_v7 = vsub.f32 %v2323_v42, %v2345_v4  ;;  %v2356_v8 = vsub.f32 %v2324_v43, %v2348_v5  ;;  %v3710_v4 = vld [vmem:[%s4809_s28 + $0x8] sm:$0xff]  }
 0xe80   : > { %3769 = vpow2.f32 %v2367_v3  ;;  %v2373_v9 = vsel %vm1409_vm5, %v3760_v6, 0.0 }
 0xe81   : > { %v3762_v10 = vpop.eup %3761  ;;  %v2369_v11 = vmul.f32 1.442695, %v2355_v7  ;;  %v2371_v12 = vmul.f32 1.442695, %v2356_v8  ;;  %2374 = vadd.xlane.f32.xlu0 %v2373_v9 }
 0xe82   : > { %v2418_v13 = vpop.permute.xlu0 %2417  ;;  %v2465_v14 = vpop.permute.xlu1 %2464  ;;  %v2376_v15 = vsel %vm1409_vm5, %v3762_v10, 0.0 }
 0xe83   : > { %v3764_v16 = vpop.eup %3763  ;;  %3771 = vpow2.f32 %v2369_v11  ;;  %3470 = vmatpush3.bf16.msra.mxu1 %v2418_v13  ;;  %2377 = vadd.xlane.f32.xlu1 %v2376_v15 }
 0xe84   : > { %3773 = vpow2.f32 %v2371_v12  ;;  %3476 = vmatpush3.bf16.msra.mxu0 %v2465_v14  ;;  %3481 = vmatprep.subr.bf16.mxu1 %v4089_v0  ;;  %v2382_v27 = vsel %vm1409_vm5, %v3764_v16, 0.0 }
 0xe85   : > { %v3766_v19 = vpop.eup %3765  ;;  %3487 = vmatprep.subr.bf16.mxu0 %v4089_v0 }
 0xe86   : > { %v2379_v20 = vsel %vm1409_vm5, %v3766_v19, 0.0 }
 0xe87   : > { %2380 = vadd.xlane.f32.xlu0 %v2379_v20  ;;  %2383 = vadd.xlane.f32.xlu1 %v2382_v27 }
 0xe89   : > { %v3768_v21 = vpop.eup %3767 }
 0xe8a   : > { %v3770_v22 = vpop.eup %3769  ;;  %v2385_v23 = vsel %vm1409_vm5, %v3768_v21, 0.0 }
 0xe8b   : > { %2386 = vadd.xlane.f32.xlu0 %v2385_v23  ;;  %v2388_v24 = vsel %vm1409_vm5, %v3770_v22, 0.0 }
 0xe8c   : > { %2389 = vadd.xlane.f32.xlu1 %v2388_v24 }
 0xe8d   : > { %v3772_v25 = vpop.eup %3771 }
 0xe8e   : > { %v3774_v26 = vpop.eup %3773  ;;  %v2391_v28 = vsel %vm1409_vm5, %v3772_v25, 0.0 }
 0xe8f   : > { %2392 = vadd.xlane.f32.xlu0 %v2391_v28  ;;  %v2394_v29 = vsel %vm1409_vm5, %v3774_v26, 0.0 }
 0xe90   : > { %2395 = vadd.xlane.f32.xlu1 %v2394_v29 }
 0xea1   : > { %2511 = vrot.lane.b32.xlu1 %v4616_v57, %s4807_s0  ;;  %s4815_s0 = sld [smem:[#allocation30_spill]] }
 0xea5   : > { %2558 = vrot.lane.b32.xlu0 %v4616_v57, %s4808_s18  ;;  %s4816_s18 = sld [smem:[#allocation26_spill]] }
 0xf0e   : > { %v2375_v30 = vpop.xlane.xlu0 %2374 }
 0xf0f   : > { %3775 = vrcp.f32 %v2375_v30 }
 0xf10   : > { %v2378_v31 = vpop.xlane.xlu1 %2377 }
 0xf11   : > { %3777 = vrcp.f32 %v2378_v31 }
 0xf14   : > { %v2381_v32 = vpop.xlane.xlu0 %2380  ;;  %v2384_v33 = vpop.xlane.xlu1 %2383 }
 0xf15   : > { %3779 = vrcp.f32 %v2381_v32 }
 0xf16   : > { %3781 = vrcp.f32 %v2384_v33 }
 0xf18   : > { %v2387_v34 = vpop.xlane.xlu0 %2386 }
 0xf19   : > { %v3776_v17 = vpop.eup %3775  ;;  %3783 = vrcp.f32 %v2387_v34  ;;  %v2390_v35 = vpop.xlane.xlu1 %2389 }
 0xf1a   : > { %3785 = vrcp.f32 %v2390_v35  ;;  %v2405_v36 = vmul.f32 %v3776_v17, %v3760_v6  ;;  %v3255_v35 = vld [vmem:[%s4813_s1] ss:$0 sm:$0xff]  ;;  %s4820_s1 = sld [smem:[#allocation32_spill]] }
 0xf1b   : > { %v3778_v18 = vpop.eup %3777 }
 0xf1c   : > { %v2406_v37 = vmul.f32 %v3778_v18, %v3762_v10  ;;  %v2393_v38 = vpop.xlane.xlu0 %2392 }
 0xf1d   : > { %3787 = vrcp.f32 %v2393_v38  ;;  %v2396_v39 = vpop.xlane.xlu1 %2395 }
 0xf1e   : > { %3789 = vrcp.f32 %v2396_v39  ;;  %v2413_v57 = vpack.c.bf16 %v2406_v37, %v2405_v36 }
 0xf1f   : > { %v3780_v40 = vpop.eup %3779 }
 0xf20   : > { %v3782_v41 = vpop.eup %3781  ;;  %v2407_v42 = vmul.f32 %v3780_v40, %v3766_v19  ;;  %3472 = vmatmul.mubr.msk.bf16.vlgmr.msra.gmra.mrb[36].mxu1 %vm1409_vm5, %v2413_v57  ;;  %v2559_v53 = vpop.permute.xlu0 %2558 }
 0xf21   : > { %v2408_v43 = vmul.f32 %v3782_v41, %v3764_v16  ;;  %v2512_v44 = vpop.permute.xlu1 %2511  ;;  %3483 = vmatprep.mubr.msk.bf16.mxu1 %vm4090_vm0, %v4089_v0 }
 0xf22   : > { %3482 = vmatpush3.bf16.msra.mxu1 %v2512_v44 }
 0xf23   : > { %v3784_v48 = vpop.eup %3783  ;;  %v2414_v50 = vpack.c.bf16 %v2408_v43, %v2407_v42  ;;  %3493 = vmatprep.subr.bf16.mxu1 %v4089_v0 }
 0xf24   : > { %v3786_v51 = vpop.eup %3785  ;;  %v2409_v52 = vmul.f32 %v3784_v48, %v3768_v21 }
 0xf25   : > { %v2410_v45 = vmul.f32 %v3786_v51, %v3770_v22  ;;  %3478 = vmatmul.mubr.msk.bf16.vlgmr.msra.gmra.mrb[36].mxu0 %vm1409_vm5, %v2414_v50 }
 0xf26   : > { %3488 = vmatpush3.bf16.msra.mxu0 %v2559_v53  ;;  %3489 = vmatprep.mubr.msk.bf16.mxu0 %vm4090_vm0, %v4089_v0 }
 0xf27   : > { %v3788_v49 = vpop.eup %3787  ;;  %v2415_v54 = vpack.c.bf16 %v2410_v45, %v2409_v52  ;;  %3501 = vmatprep.subr.bf16.mxu0 %v4089_v0 }
 0xf28   : > { %v3790_v55 = vpop.eup %3789  ;;  %v2411_v56 = vmul.f32 %v3788_v49, %v3772_v25 }
 0xf29   : > { %v2412_v58 = vmul.f32 %v3790_v55, %v3774_v26  ;;  %3484 = vmatmul.mubr.msk.bf16.vlgmr.msra.gmra.mrb[40].mxu1 %vm1409_vm5, %v2415_v54  ;;  %v3711_v54 = vld [vmem:[%s4814_s11] sm:$0xff]   ;;  %v3712_v55 = vld [vmem:[%s4814_s11 + $0x8] sm:$0xff]  }
 0xf2a   : > { %3497 = vmatprep.mubr.msk.bf16.mxu1 %vm4090_vm0, %v4089_v0  ;;  %3494 = vmatpush3.bf16.msra.mxu1 %v3709_v63 }
 0xf2b   : > { %v2416_v59 = vpack.c.bf16 %v2412_v58, %v2411_v56  ;;  %3495 = vmatprep.subr.bf16.mxu1 %v4089_v0  ;;  %v3713_v56 = vld [vmem:[%s4815_s0] sm:$0xff]   ;;  %v3714_v58 = vld [vmem:[%s4815_s0 + $0x8] sm:$0xff]  }
 0xf2d   : > { %3490 = vmatmul.mubr.msk.bf16.vlgmr.msra.gmra.mrb[40].mxu0 %vm1409_vm5, %v2416_v59 }
 0xf2e   : > { %3505 = vmatprep.mubr.msk.bf16.mxu0 %vm4090_vm0, %v4089_v0  ;;  %3496 = vmatpush3.bf16.msra.mxu1 %v3710_v4  ;;  %v3259_v4 = vld [vmem:[%s4816_s18] ss:$0 sm:$0xff]  ;;  %s4821_s18 = sshll.u32 %s4823_s7, 3 }
 0xf2f   : > { %3509 = vmatprep.subr.bf16.mxu1 %v4089_v0  ;;  %3502 = vmatpush3.bf16.msra.mxu0 %v3711_v54  ;;  %v3271_v54 = vld [vmem:[%s4820_s1] ss:$0 sm:$0xff] }
 0xf30   : > { %3503 = vmatprep.subr.bf16.mxu0 %v4089_v0 }
 0xf33   : > { %3504 = vmatpush3.bf16.msra.mxu0 %v3712_v55 }
 0xf34   : > { %3521 = vmatprep.subr.bf16.mxu0 %v4089_v0 }
 0xff3   : > { %v2457_v60 = vpop.f32.mrb[36].mxu1 }
 0xff4   : > { %v3473_v61 = vpop.f32.mrb[37].mxu1 }
 0xff5   : > { %v2460_v62 = vpop.f32.mrb[38].mxu1 }
 0xff6   : > { %v3474_v1 = vpop.f32.mrb[39].mxu1 }
 0xff8   : > { %v2504_v2 = vpop.f32.mrb[36].mxu0 }
 0xff9   : > { %v3479_v3 = vpop.f32.mrb[37].mxu0 }
 0xffa   : > { %v2507_v5 = vpop.f32.mrb[38].mxu0 }
 0xffb   : > { %v3680_v6 = vpack.i.bf16 %v2507_v5, %v2504_v2  ;;  %v3480_v7 = vpop.f32.mrb[39].mxu0 }
 0xffc   : > { %v2551_v8 = vpop.f32.mrb[40].mxu1 }
 0xffd   : > { %v3485_v9 = vpop.f32.mrb[41].mxu1  ;;  %3681 = vrot.lane.b32.xlu1 %v3680_v6, %s4810_s2  ;;  %s4817_s2 = sld [smem:[#allocation27_spill]] }
 0xffe   : > { %v2554_v10 = vpop.f32.mrb[42].mxu1 }
 0xfff   : > { %v3685_v11 = vpack.i.bf16 %v2554_v10, %v2551_v8  ;;  %v3486_v12 = vpop.f32.mrb[43].mxu1 }
0x1000   : > { %v2598_v13 = vpop.f32.mrb[40].mxu0 }
0x1001   : > { %3686 = vrot.lane.b32.xlu0 %v3685_v11, %s4811_s16  ;;  %v3491_v14 = vpop.f32.mrb[41].mxu0  ;;  %s4818_s16 = sld [smem:[#allocation29_spill]] }
0x1002   : > { %v2601_v15 = vpop.f32.mrb[42].mxu0  ;;  %v3716_v14 = vld [vmem:[%s4815_s0 + $0x18] sm:$0xff]  }
0x1003   : > { %v3690_v16 = vpack.i.bf16 %v2601_v15, %v2598_v13  ;;  %v3492_v19 = vpop.f32.mrb[43].mxu0  ;;  %v3260_v8 = vld [vmem:[%s4817_s2] ss:$0 sm:$0xff]  ;;  %v3715_v13 = vld [vmem:[%s4815_s0 + $0x10] sm:$0xff]   ;;  %s1033_s2 = scalar_lea.vmem %s4264_s30, %s4821_s18 }
0x1005   : > { %3691 = vrot.lane.b32.xlu1 %v3690_v16, %s4812_s10  ;;  %s4819_s10 = sld [smem:[#allocation31_spill]] }
0x1007   : > { %v3261_v15 = vld [vmem:[%s4818_s16] ss:$0 sm:$0xff] }
0x106f   : > { %v3682_v20 = vpop.permute.xlu1 %3681 }
0x1070   : > { %v3684_v21 = vunpack.i.h.bf16 %v3682_v20  ;;  %v3683_v22 = vunpack.i.l.bf16 %v3682_v20 }
0x1072   : > { %v2630_v26 = vsel %vm1192_vm2, %v2460_v62, %v3684_v21  ;;  %v2629_v28 = vsel %vm1192_vm2, %v2457_v60, %v3683_v22 }
0x1073   : > { %v3687_v27 = vpop.permute.xlu0 %3686 }
0x1074   : > { %v3689_v23 = vunpack.i.h.bf16 %v3687_v27  ;;  %v3688_v24 = vunpack.i.l.bf16 %v3687_v27 }
0x1076   : > { %v2631_v31 = vsel %vm1409_vm5, %v2629_v28, %v3688_v24  ;;  %v2632_v32 = vsel %vm1409_vm5, %v2630_v26, %v3689_v23  ;;  %v3265_v26 = vld [vmem:[%s4819_s10] ss:$0 sm:$0xff] }
0x1077   : > { %v3692_v25 = vpop.permute.xlu1 %3691 }
0x1078   : > { %v3694_v29 = vunpack.i.h.bf16 %v3692_v25  ;;  %v3693_v30 = vunpack.i.l.bf16 %v3692_v25 }
0x107a   : > { %v2634_v33 = vsel %vm1718_vm6, %v2632_v32, %v3694_v29  ;;  %v2633_v34 = vsel %vm1718_vm6, %v2631_v31, %v3693_v30 }
0x107b   : > { %v2635_v17 = vpack.c.bf16 %v2634_v33, %v2633_v34 }
0x107d   : > { %3498 = vmatmul.mubr.msk.bf16.vlgmr.msra.gmra.mrb[44].mxu1 %vm1062_vm1, %v2635_v17 }
0x107e   : > { %3517 = vmatprep.mubr.msk.bf16.mxu1 %vm4090_vm0, %v4089_v0  ;;  %3510 = vmatpush3.bf16.msra.mxu1 %v3713_v56 }
0x107f   : > { %3511 = vmatprep.subr.bf16.mxu1 %v4089_v0 }
0x1082   : > { %3512 = vmatpush3.bf16.msra.mxu1 %v3714_v58 }
0x1083   : > { %3513 = vmatprep.subr.bf16.mxu1 %v4089_v0 }
0x1086   : > { %3514 = vmatpush3.bf16.msra.mxu1 %v3715_v13 }
0x1087   : > { %3515 = vmatprep.subr.bf16.mxu1 %v4089_v0 }
0x108a   : > { %3516 = vmatpush3.bf16.msra.mxu1 %v3716_v14 }
0x1150   : > { %v2696_v18 = vpop.f32.mrb[44].mxu1 }
0x1151   : > { %v2697_v36 = vadd.f32 %v3255_v35, %v2696_v18  ;;  %v3499_v37 = vpop.f32.mrb[45].mxu1 }
0x1152   : > { %v2699_v38 = vpop.f32.mrb[46].mxu1 }
0x1153   : > { %v2700_v39 = vadd.f32 %v3255_v35, %v2699_v38  ;;  %v3500_v57 = vpop.f32.mrb[47].mxu1  ;;  %v2703_v40 = vadd.f32 %v2697_v36, %v4606_v46 }
0x1155   : > { %v2707_v41 = vsel %vm1062_vm1, %v2703_v40, 0.0  ;;  %v2704_v42 = vadd.f32 %v2700_v39, %v4608_v47 }
0x1156   : > { %2708 = vadd.xlane.f32.xlu0 %v2707_v41 }
0x1157   : > { %v2710_v43 = vsel %vm1062_vm1, %v2704_v42, 0.0 }
0x1158   : > { %2711 = vadd.xlane.f32.xlu1 %v2710_v43 }
0x11e3   : > { %v2709_v44 = vpop.xlane.xlu0 %2708 }
0x11e4   : > { %v2713_v48 = vmul.f32 0.03125, %v2709_v44 }
0x11e5   : > { %v2712_v50 = vpop.xlane.xlu1 %2711 }
0x11e6   : > { %v2715_v51 = vsub.f32 %v2703_v40, %v2713_v48  ;;  %v2714_v52 = vmul.f32 0.03125, %v2712_v50  ;;  %v3717_v48 = vld [vmem:[%s4254_s27] sm:$0xff]   ;;  %v3718_v50 = vld [vmem:[%s4254_s27 + $0x8] sm:$0xff]  }
0x11e8   : > { %v2716_v45 = vsub.f32 %v2704_v42, %v2714_v52  ;;  %v2717_v53 = vmul.f32 %v2715_v51, %v2715_v51 }
0x11ea   : > { %v2719_v46 = vsel %vm1062_vm1, %v2717_v53, 0.0  ;;  %v2718_v49 = vmul.f32 %v2716_v45, %v2716_v45 }
0x11eb   : > { %2720 = vadd.xlane.f32.xlu0 %v2719_v46 }
0x11ec   : > { %v2722_v47 = vsel %vm1062_vm1, %v2718_v49, 0.0 }
0x11ef   : > { %2723 = vadd.xlane.f32.xlu0 %v2722_v47 }
0x1278   : > { %v2721_v59 = vpop.xlane.xlu0 %2720 }
0x1279   : > { %v2725_v60 = vmul.f32 0.03125, %v2721_v59 }
0x127b   : > { %v2727_v61 = vadd.f32 1e-05, %v2725_v60 }
0x127c   : > { %v2724_v62 = vpop.xlane.xlu0 %2723 }
0x127d   : > { %3791 = vrsqrt.f32 %v2727_v61  ;;  %v2726_v63 = vmul.f32 0.03125, %v2724_v62 }
0x127f   : > { %v2728_v1 = vadd.f32 1e-05, %v2726_v63 }
0x1281   : > { %3793 = vrsqrt.f32 %v2728_v1  ;;  %v3273_v1 = vld [vmem:[%s4259_s4] ss:$0 sm:$0xff] }
0x1287   : > { %v3792_v2 = vpop.eup %3791 }
0x1288   : > { %v2731_v3 = vmul.f32 %v3792_v2, %v2715_v51 }
0x128a   : > { %v2739_v6 = vmul.f32 %v3259_v4, %v2731_v3 }
0x128b   : > { %v3794_v5 = vpop.eup %3793 }
0x128c   : > { %v2732_v7 = vmul.f32 %v3794_v5, %v2716_v45  ;;  %v2747_v10 = vadd.f32 %v3260_v8, %v2739_v6 }
0x128e   : > { %v2740_v9 = vmul.f32 %v3259_v4, %v2732_v7 }
0x1290   : > { %v2748_v11 = vadd.f32 %v3260_v8, %v2740_v9 }
0x1292   : > { %v2749_v12 = vpack.c.bf16 %v2748_v11, %v2747_v10 }
0x1294   : > { %3506 = vmatmul.mubr.msk.bf16.vlgmr.msra.gmra.mrb[44].mxu0 %vm1062_vm1, %v2749_v12 }
0x1295   : > { %3525 = vmatprep.mubr.msk.bf16.mxu0 %vm4090_vm0, %v4089_v0  ;;  %3522 = vmatpush3.bf16.msra.mxu0 %v3717_v48 }
0x1296   : > { %3523 = vmatprep.subr.bf16.mxu0 %v4089_v0  ;;  %v3272_v0 = vld [vmem:[%s4249_s19] ss:$0 sm:$0xff] }
0x1299   : > { %3524 = vmatpush3.bf16.msra.mxu0 %v3718_v50 }
0x1367   : > { %v2810_v16 = vpop.f32.mrb[44].mxu0 }
0x1368   : > { %v2811_v19 = vadd.f32 %v3261_v15, %v2810_v16  ;;  %v3507_v20 = vpop.f32.mrb[45].mxu0 }
0x1369   : > { %v2813_v27 = vpop.f32.mrb[46].mxu0 }
0x136a   : > { %v2814_v21 = vadd.f32 %v3261_v15, %v2813_v27  ;;  %v3508_v22 = vpop.f32.mrb[47].mxu0  ;;  %v2817_v23 = vmax.f32 %v2811_v19, 0.0 }
0x136c   : > { %v2818_v24 = vmax.f32 %v2814_v21, 0.0 }
0x136e   : > { %v2819_v25 = vpack.c.bf16 %v2818_v24, %v2817_v23 }
0x1370   : > { %3518 = vmatmul.mubr.msk.bf16.vlgmr.msra.gmra.mrb[48].mxu1 %vm1946_vm7, %v2819_v25 }
0x1443   : > { %v2896_v28 = vpop.f32.mrb[48].mxu1 }
0x1444   : > { %v2897_v29 = vadd.f32 %v3265_v26, %v2896_v28  ;;  %v3519_v30 = vpop.f32.mrb[49].mxu1 }
0x1445   : > { %v2899_v31 = vpop.f32.mrb[50].mxu1 }
0x1446   : > { %v2900_v32 = vadd.f32 %v3265_v26, %v2899_v31  ;;  %v3520_v33 = vpop.f32.mrb[51].mxu1  ;;  %v2903_v34 = vadd.f32 %v2897_v29, %v2747_v10 }
0x1448   : > { %v2907_v17 = vsel %vm1062_vm1, %v2903_v34, 0.0  ;;  %v2904_v35 = vadd.f32 %v2900_v32, %v2748_v11 }
0x1449   : > { %2908 = vadd.xlane.f32.xlu1 %v2907_v17 }
0x144a   : > { %v2910_v18 = vsel %vm1062_vm1, %v2904_v35, 0.0 }
0x144b   : > { %2911 = vadd.xlane.f32.xlu0 %v2910_v18 }
0x14d6   : > { %v2909_v36 = vpop.xlane.xlu1 %2908 }
0x14d7   : > { %v2913_v37 = vmul.f32 0.03125, %v2909_v36 }
0x14d8   : > { %v2912_v38 = vpop.xlane.xlu0 %2911 }
0x14d9   : > { %v2915_v39 = vsub.f32 %v2903_v34, %v2913_v37  ;;  %v2914_v57 = vmul.f32 0.03125, %v2912_v38 }
0x14db   : > { %v2916_v40 = vsub.f32 %v2904_v35, %v2914_v57  ;;  %v2917_v41 = vmul.f32 %v2915_v39, %v2915_v39 }
0x14dd   : > { %v2919_v42 = vsel %vm1062_vm1, %v2917_v41, 0.0  ;;  %v2918_v43 = vmul.f32 %v2916_v40, %v2916_v40 }
0x14de   : > { %2920 = vadd.xlane.f32.xlu1 %v2919_v42 }
0x14df   : > { %v2922_v44 = vsel %vm1062_vm1, %v2918_v43, 0.0 }
0x14e0   : > { %2923 = vadd.xlane.f32.xlu0 %v2922_v44 }
0x156b   : > { %v2921_v51 = vpop.xlane.xlu1 %2920 }
0x156c   : > { %v2925_v52 = vmul.f32 0.03125, %v2921_v51 }
0x156d   : > { %v2924_v45 = vpop.xlane.xlu0 %2923 }
0x156e   : > { %v2927_v53 = vadd.f32 1e-05, %v2925_v52  ;;  %v2926_v46 = vmul.f32 0.03125, %v2924_v45 }
0x1570   : > { %3795 = vrsqrt.f32 %v2927_v53  ;;  %v2928_v49 = vadd.f32 1e-05, %v2926_v46 }
0x1572   : > { %3797 = vrsqrt.f32 %v2928_v49 }
0x157a   : > { %v3796_v47 = vpop.eup %3795 }
0x157b   : > { %v2931_v55 = vmul.f32 %v3796_v47, %v2915_v39 }
0x157c   : > { %v3798_v56 = vpop.eup %3797 }
0x157d   : > { %v2939_v58 = vmul.f32 %v3271_v54, %v2931_v55  ;;  %v2932_v59 = vmul.f32 %v3798_v56, %v2916_v40 }
0x157f   : > { %v2940_v60 = vmul.f32 %v3271_v54, %v2932_v59  ;;  %v2947_v61 = vadd.f32 %v3272_v0, %v2939_v58 }
0x1581   : > { %v2948_v62 = vadd.f32 %v3272_v0, %v2940_v60 }
0x1583   : > { %v2949_v63 = vpack.c.bf16 %v2948_v62, %v2947_v61 }
0x1585   : > { %3526 = vmatmul.mubr.msk.bf16.vlgmr.msra.gmra.mrb[48].mxu0 %vm1062_vm1, %v2949_v63 }
0x1658   : > { %v3010_v2 = vpop.f32.mrb[48].mxu0 }
0x1659   : > { %v3011_v3 = vadd.f32 %v3273_v1, %v3010_v2  ;;  %v3527_v4 = vpop.f32.mrb[49].mxu0 }
0x165a   : > { %v3013_v5 = vpop.f32.mrb[50].mxu0 }
0x165b   : > { %3017 = vst.msk [vmem:[%s1033_s2] sm:$0xff] %vm1062_vm1, %v3011_v3  ;;  %v3014_v6 = vadd.f32 %v3273_v1, %v3013_v5  ;;  %v3528_v7 = vpop.f32.mrb[51].mxu0 }
0x165d   : > { %3018 = vst.msk [vmem:[%s1033_s2 + $0x8] sm:$0xff] %vm1062_vm1, %v3014_v6 }
0x165e PF: > { %s76_s15 = sadd.s32 1, %s4049_s15  }
0x165f   : > { %p73_p7 = scmp.ge.s32.totalorder %s76_s15, 4  }
0x1661   :  { %75 = sbr.rel (!%p73_p7) target bundleno = 53 (0x35), region = 233 }
0x1668   :  { %3041 = vsyncpa [#allocation3], 1 }
0x1669   :  { %3043 = vsyncpa [#allocation3 + $0x1], 1 }
0x166a   :  { %3044 = vsyncpa [#allocation5], 1 }
0x166b   :  { %3045 = vsyncpa [#allocation8], 1 }
0x166c   :  { %3046 = vsyncpa [#allocation11], 1 }
0x166d   :  { %3047 = vsyncpa [#allocation14], 1 }

</bundles_post_ra>
